<compile_context>
chip_gen: v5e
topology: v5e:2x2
jax: 0.10.0
libtpu: 0.0.40
codegen_flags: <defaults>
</compile_context>

<pallas_src>
import jax
import jax.numpy as jnp
from jax.experimental import pallas as pl
from jax.experimental.pallas import tpu as pltpu


def _pick_time_block(t, cap=8):
    if t <= cap:
        return t
    tb = cap
    while t % tb:
        tb -= 1
    return tb


# ---------------------------------------------------------------------------
# Fused kernel:
#   inflated Conv3d(3x3x3, pad=1, stride=1) + BN(eval) + ReLU
#   + MaxPool3d((1,2,2), stride=(1,2,2))
#   + _Channel3d (two inflated 1x1x1 conv + BN + ReLU branches, summed)
# ---------------------------------------------------------------------------
def _i3hourglass_kernel(xprev_ref, xmain_ref, xnext_ref, w9_ref,
                        csc_ref, csh_ref, wch_ref, sch_ref, bch_ref, o_ref):
    # xprev/xnext: (1, 1, H+2, Wp*Cin) bf16  temporal halo slices (replicate)
    # xmain:       (1, TB, H+2, Wp*Cin) bf16 time block
    # w9:          (9, Wp*Cin, W*Cmid) bf16  banded conv weights, idx kt*3+kh,
    #              output columns ordered (pool-parity, w2, cmid)
    # csc/csh:     (1, W*Cmid) f32           folded conv-bias + BN scale/shift
    # wch:         (W2*Cmid, 2*W2*Cout) bf16 block-diag 1x1 weights [br1|br2]
    # sch/bch:     (1, 2*W2*Cout) f32        folded BN scale/shift of branches
    # o:           (1, TB, H2, W2*Cout)      final module output block
    TB = xmain_ref.shape[1]
    Hp2 = xmain_ref.shape[2]
    H = Hp2 - 2
    H2 = o_ref.shape[2]
    WCm = w9_ref.shape[2]            # W * Cmid (lane-dense conv output width)
    W2C = o_ref.shape[3]             # W2 * Cout
    half = WCm // 2                  # W2 * Cmid

    # Load the TB+2 padded-time slabs once; reused across the static lt loop.
    slabs = ([xprev_ref[0, 0]]
             + [xmain_ref[0, lt] for lt in range(TB)]
             + [xnext_ref[0, 0]])

    csc = csc_ref[0]
    csh = csh_ref[0]
    wch = wch_ref[...]
    sch = sch_ref[0]
    bch = bch_ref[0]

    for lt in range(TB):                                  # static unroll
        # ---- inflated 3x3x3 conv: 9 banded matmuls, K = (W+2)*Cin ----
        acc = jnp.zeros((H, WCm), jnp.float32)
        for ti in range(3):                               # kt (time tap)
            slab = slabs[lt + ti]                         # (H+2, Wp*Cin) bf16
            for dh in range(3):                           # kh (row tap)
                acc = acc + jnp.dot(slab[dh:dh + H, :], w9_ref[ti * 3 + dh],
                                    preferred_element_type=jnp.float32)

        # ---- folded BN + ReLU on the lane-dense (H, W*Cmid) slab ----
        y = jnp.maximum(acc * csc + csh, 0.0)

        # ---- MaxPool3d(1,2,2) entirely in registers ----
        y4 = y.reshape(H2, 2, WCm)
        y = jnp.maximum(y4[:, 0], y4[:, 1])               # H-direction pairs
        pooled = jnp.maximum(y[:, :half], y[:, half:])    # W-direction pairs
                                                          # -> (H2, W2*Cmid)

        # ---- _Channel3d: both 1x1 branches in one block-diag matmul ----
        z = jnp.dot(pooled.astype(jnp.bfloat16), wch,
                    preferred_element_type=jnp.float32)   # (H2, 2*W2*Cout)
        z = jnp.maximum(z * sch + bch, 0.0)
        o_ref[0, lt] = (z[:, :W2C] + z[:, W2C:]).astype(o_ref.dtype)


def i3hourglass_forward(x_ncthw, params, t_block=None):
    """NCTHW f32 -> (N, Cout, T, H/2, W/2) f32, fully fused in one kernel."""
    conv_w = params["conv_w"]                      # (kt, kh, kw, Cin, Cmid)
    Cin, Cmid = conv_w.shape[3], conv_w.shape[4]
    w1, w2 = params["w1"], params["w2"]            # (Cmid, Cout) each
    Cout = w1.shape[1]

    x = jnp.transpose(x_ncthw, (0, 2, 3, 4, 1))    # NCTHW -> NTHWC
    N, T, H, W, _ = x.shape
    assert H % 2 == 0 and W % 2 == 0, "MaxPool3d(1,2,2) requires even H, W"
    H2, W2 = H // 2, W // 2
    Wp = W + 2
    WC = Wp * Cin
    TB = t_block or _pick_time_block(T)
    assert T % TB == 0, (T, TB)

    # Spatial zero pad (Conv2d padding=1 semantics) and fold (W, Cin) into the
    # lane dim so all W shifts live inside the banded weights (no in-kernel
    # im2col).  bf16 MXU operands; the temporal replicate pad is expressed by
    # the clamped halo index_maps (no time pad in HBM).
    xp = jnp.pad(x, ((0, 0), (0, 0), (1, 1), (1, 1), (0, 0)))
    xb = xp.reshape(N, T, H + 2, WC).astype(jnp.bfloat16)

    # Banded conv weights: B[kt*3+kh][(w_in*Cin+ci), col] with
    # col = p*(W2*Cmid) + w2*Cmid + co  (p = output-w parity, so the W-pool is
    # a max of the two lane halves in-kernel).
    onehot = (jnp.arange(Wp)[:, None]
              == (jnp.arange(W)[None, :]
                  + jnp.arange(3)[:, None, None])).astype(jnp.float32)  # (3,Wp,W)
    band = jnp.einsum("diw,thdcf->thicwf", onehot, conv_w)   # (3,3,Wp,Cin,W,Cmid)
    band = band.reshape(3, 3, Wp, Cin, W2, 2, Cmid)
    band = jnp.swapaxes(band, 4, 5)                          # (...,p,w2,Cmid)
    w9 = band.reshape(9, WC, W * Cmid).astype(jnp.bfloat16)

    csc = jnp.tile(params["conv_scale"], W).reshape(1, W * Cmid)
    csh = jnp.tile(params["conv_shift"], W).reshape(1, W * Cmid)

    # _Channel3d 1x1 branches as one block-diagonal matmul over w2.
    eye = jnp.eye(W2, dtype=jnp.float32)
    wch = jnp.concatenate([jnp.kron(eye, w1), jnp.kron(eye, w2)],
                          axis=1).astype(jnp.bfloat16)       # (W2*Cmid, 2*W2*Cout)
    sch = jnp.concatenate([jnp.tile(params["s1"], W2),
                           jnp.tile(params["s2"], W2)]).reshape(1, 2 * W2 * Cout)
    bch = jnp.concatenate([jnp.tile(params["b1"], W2),
                           jnp.tile(params["b2"], W2)]).reshape(1, 2 * W2 * Cout)

    const2 = lambda n, j: (0, 0)
    const3 = lambda n, j: (0, 0, 0)

    out = pl.pallas_call(
        _i3hourglass_kernel,
        out_shape=jax.ShapeDtypeStruct((N, T, H2, W2 * Cout), x.dtype),
        grid_spec=pltpu.PrefetchScalarGridSpec(
            num_scalar_prefetch=0,
            grid=(N, T // TB),
            in_specs=[
                # temporal halo (t0-1, clamped) -- replicate padding
                pl.BlockSpec((1, 1, H + 2, WC),
                             lambda n, j: (n, jnp.maximum(j * TB - 1, 0), 0, 0)),
                # main TB-deep time block
                pl.BlockSpec((1, TB, H + 2, WC), lambda n, j: (n, j, 0, 0)),
                # temporal halo (t0+TB, clamped) -- replicate padding
                pl.BlockSpec((1, 1, H + 2, WC),
                             lambda n, j: (n, jnp.minimum(j * TB + TB, T - 1), 0, 0)),
                pl.BlockSpec((9, WC, W * Cmid), const3),
                pl.BlockSpec((1, W * Cmid), const2),
                pl.BlockSpec((1, W * Cmid), const2),
                pl.BlockSpec((W2 * Cmid, 2 * W2 * Cout), const2),
                pl.BlockSpec((1, 2 * W2 * Cout), const2),
                pl.BlockSpec((1, 2 * W2 * Cout), const2),
            ],
            out_specs=pl.BlockSpec((1, TB, H2, W2 * Cout),
                                   lambda n, j: (n, j, 0, 0)),
        ),
        compiler_params=pltpu.CompilerParams(
            dimension_semantics=("parallel", "parallel"),
            vmem_limit_bytes=32 * 1024 * 1024),
    )(xb, xb, xb, w9, csc, csh, wch, sch, bch)

    out = out.reshape(N, T, H2, W2, Cout)
    return jnp.transpose(out, (0, 4, 1, 2, 3))               # NTHWC -> NCTHW


# ---------------------------------------------------------------------------
# Parameter construction (deterministic, mimics the 2D -> 3D inflation)
# ---------------------------------------------------------------------------
def init_params(key, cin, cmid, cout, eps=1e-5):
    ks = jax.random.split(key, 8)

    # Stem: Conv2d(cin, cmid, 3, padding=1) inflated over time_dim=3 (+BN, ReLU)
    w2d = 0.1 * jax.random.normal(ks[0], (cmid, cin, 3, 3), jnp.float32)
    bias = 0.05 * jax.random.normal(ks[1], (cmid,), jnp.float32)
    w3d = jnp.repeat(w2d[:, :, None, :, :], 3, axis=2) / 3.0   # (Co,Ci,kt,kh,kw)
    conv_w = jnp.transpose(w3d, (2, 3, 4, 1, 0))               # (kt,kh,kw,Ci,Co)
    gamma = 1.0 + 0.1 * jax.random.normal(ks[2], (cmid,), jnp.float32)
    beta = 0.1 * jax.random.normal(ks[3], (cmid,), jnp.float32)
    mean = 0.1 * jax.random.normal(ks[4], (cmid,), jnp.float32)
    var = jax.random.uniform(ks[5], (cmid,), jnp.float32, 0.5, 1.5)
    s = gamma / jnp.sqrt(var + eps)
    conv_scale = s
    conv_shift = (bias - mean) * s + beta

    # _Channel3d: two branches of Conv2d(cmid, cout, 1) inflated with time_dim=1,
    # each followed by BN + ReLU; forward = branch1(x) + branch2(x)
    def branch(k):
        kk = jax.random.split(k, 6)
        w = 0.1 * jax.random.normal(kk[0], (cout, cmid, 1, 1), jnp.float32)
        b = 0.05 * jax.random.normal(kk[1], (cout,), jnp.float32)
        g = 1.0 + 0.1 * jax.random.normal(kk[2], (cout,), jnp.float32)
        be = 0.1 * jax.random.normal(kk[3], (cout,), jnp.float32)
        mu = 0.1 * jax.random.normal(kk[4], (cout,), jnp.float32)
        v = jax.random.uniform(kk[5], (cout,), jnp.float32, 0.5, 1.5)
        sc = g / jnp.sqrt(v + eps)
        wm = jnp.transpose(w[:, :, 0, 0], (1, 0))   # (cmid, cout)
        return wm, sc, (b - mu) * sc + be

    w1, s1, b1 = branch(ks[6])
    w2, s2, b2 = branch(ks[7])
    return dict(conv_w=conv_w, conv_scale=conv_scale, conv_shift=conv_shift,
                w1=w1, s1=s1, b1=b1, w2=w2, s2=s2, b2=b2)


class I3HourGlassPallas:
    """Pallas equivalent of I3HourGlass.forward for the synthetic inflated net:
       [Conv3d(3x3x3)+BN+ReLU+MaxPool3d(1,2,2)] + _Channel3d, all in one
       fused kernel."""

    def __init__(self, params, frame_nb, t_block=None):
        self.params = params
        self.frame_nb = frame_nb
        self.t_block = t_block

    def __call__(self, x_ncthw):
        return i3hourglass_forward(x_ncthw, self.params, self.t_block)


def reference_forward(x_ncthw, p):
    # Pure-JAX reference using the SAME bf16 MXU operands / f32 accumulation as
    # the kernel (so the comparison isolates kernel bugs, not bf16 rounding).
    x = jnp.transpose(x_ncthw, (0, 2, 3, 4, 1))
    N, T, H, W, Cin = x.shape
    w = p["conv_w"].astype(jnp.bfloat16)
    Cmid = w.shape[-1]
    xp = jnp.pad(x, ((0, 0), (0, 0), (1, 1), (1, 1), (0, 0)))
    xp = jnp.concatenate([xp[:, :1], xp, xp[:, -1:]], axis=1)   # replicate time
    xp = xp.astype(jnp.bfloat16)
    acc = jnp.zeros((N, T, H, W, Cmid), jnp.float32)
    for dt in range(3):
        for dh in range(3):
            for dw in range(3):
                patch = xp[:, dt:dt + T, dh:dh + H, dw:dw + W, :]
                acc = acc + jnp.einsum("nthwc,cd->nthwd", patch, w[dt, dh, dw],
                                       preferred_element_type=jnp.float32)
    y = jnp.maximum(acc * p["conv_scale"] + p["conv_shift"], 0.0)
    yp = y.reshape(N, T, H // 2, 2, W // 2, 2, Cmid).max(axis=(3, 5))
    ypb = yp.astype(jnp.bfloat16)
    z1 = jnp.maximum(
        jnp.einsum("nthwc,cd->nthwd", ypb, p["w1"].astype(jnp.bfloat16),
                   preferred_element_type=jnp.float32) * p["s1"] + p["b1"], 0.0)
    z2 = jnp.maximum(
        jnp.einsum("nthwc,cd->nthwd", ypb, p["w2"].astype(jnp.bfloat16),
                   preferred_element_type=jnp.float32) * p["s2"] + p["b2"], 0.0)
    return jnp.transpose(z1 + z2, (0, 4, 1, 2, 3))


if __name__ == "__main__":
    N, Cin, T, H, W = 2, 4, 4, 16, 16      # small NCDHW video
    Cmid, Cout = 8, 8

    x = jax.random.normal(jax.random.PRNGKey(0), (N, Cin, T, H, W), jnp.float32)
    params = init_params(jax.random.PRNGKey(1), Cin, Cmid, Cout)

    model = I3HourGlassPallas(params, frame_nb=T)
    out = jax.block_until_ready(model(x))
    ref = jax.block_until_ready(reference_forward(x, params))

    assert out.shape == (N, Cout, T, H // 2, W // 2), out.shape
    # Both paths use identical bf16 operands; tolerance covers f32
    # accumulation-order and bf16 re-rounding differences only.
    err = float(jnp.max(jnp.abs(out - ref)))
    assert jnp.allclose(out, ref, atol=2e-2, rtol=2e-2), err
    print("KERNEL_OK")
</pallas_src>

<mosaic_0001>
module attributes {stable_mosaic.version = 11 : i64} {
  func.func @_i3hourglass_kernel(%arg0: i32, %arg1: i32, %arg2: memref<1x1x18x72xbf16, #tpu.memory_space<vmem>>, %arg3: memref<1x4x18x72xbf16, #tpu.memory_space<vmem>>, %arg4: memref<1x1x18x72xbf16, #tpu.memory_space<vmem>>, %arg5: memref<9x72x128xbf16, #tpu.memory_space<vmem>>, %arg6: memref<1x128xf32, #tpu.memory_space<vmem>>, %arg7: memref<1x128xf32, #tpu.memory_space<vmem>>, %arg8: memref<64x128xbf16, #tpu.memory_space<vmem>>, %arg9: memref<1x128xf32, #tpu.memory_space<vmem>>, %arg10: memref<1x128xf32, #tpu.memory_space<vmem>>, %arg11: memref<1x4x8x64xf32, #tpu.memory_space<vmem>>) attributes {dimension_semantics = [#tpu.dimension_semantics<parallel>, #tpu.dimension_semantics<parallel>], iteration_bounds = array<i64: 2, 1>, scalar_prefetch = 0 : i64, scratch_operands = 0 : i64, tpu.core_type = #tpu.core_type<tc>, window_params = [{transform_indices = @transform_0, window_bounds = array<i64: 1, 1, 18, 72>}, {transform_indices = @transform_1, window_bounds = array<i64: 1, 4, 18, 72>}, {transform_indices = @transform_2, window_bounds = array<i64: 1, 1, 18, 72>}, {pipeline_mode = #tpu.pipeline_mode<synchronous>, transform_indices = @transform_3, window_bounds = array<i64: 9, 72, 128>}, {pipeline_mode = #tpu.pipeline_mode<synchronous>, transform_indices = @transform_4, window_bounds = array<i64: 1, 128>}, {pipeline_mode = #tpu.pipeline_mode<synchronous>, transform_indices = @transform_5, window_bounds = array<i64: 1, 128>}, {pipeline_mode = #tpu.pipeline_mode<synchronous>, transform_indices = @transform_6, window_bounds = array<i64: 64, 128>}, {pipeline_mode = #tpu.pipeline_mode<synchronous>, transform_indices = @transform_7, window_bounds = array<i64: 1, 128>}, {pipeline_mode = #tpu.pipeline_mode<synchronous>, transform_indices = @transform_8, window_bounds = array<i64: 1, 128>}, {transform_indices = @transform_9, window_bounds = array<i64: 1, 4, 8, 64>}]} {
    %c0 = arith.constant 0 : index
    %c0_0 = arith.constant 0 : index
    %c0_1 = arith.constant 0 : index
    %c0_2 = arith.constant 0 : index
    %0 = vector.load %arg2[%c0, %c0_0, %c0_1, %c0_2] : memref<1x1x18x72xbf16, #tpu.memory_space<vmem>>, vector<1x1x18x72xbf16>
    %1 = vector.shape_cast %0 : vector<1x1x18x72xbf16> to vector<18x72xbf16>
    %c0_3 = arith.constant 0 : index
    %c0_4 = arith.constant 0 : index
    %c0_5 = arith.constant 0 : index
    %c0_6 = arith.constant 0 : index
    %2 = vector.load %arg3[%c0_3, %c0_4, %c0_5, %c0_6] : memref<1x4x18x72xbf16, #tpu.memory_space<vmem>>, vector<1x1x18x72xbf16>
    %3 = vector.shape_cast %2 : vector<1x1x18x72xbf16> to vector<18x72xbf16>
    %c0_7 = arith.constant 0 : index
    %c1 = arith.constant 1 : index
    %c0_8 = arith.constant 0 : index
    %c0_9 = arith.constant 0 : index
    %4 = vector.load %arg3[%c0_7, %c1, %c0_8, %c0_9] : memref<1x4x18x72xbf16, #tpu.memory_space<vmem>>, vector<1x1x18x72xbf16>
    %5 = vector.shape_cast %4 : vector<1x1x18x72xbf16> to vector<18x72xbf16>
    %c0_10 = arith.constant 0 : index
    %c2 = arith.constant 2 : index
    %c0_11 = arith.constant 0 : index
    %c0_12 = arith.constant 0 : index
    %6 = vector.load %arg3[%c0_10, %c2, %c0_11, %c0_12] : memref<1x4x18x72xbf16, #tpu.memory_space<vmem>>, vector<1x1x18x72xbf16>
    %7 = vector.shape_cast %6 : vector<1x1x18x72xbf16> to vector<18x72xbf16>
    %c0_13 = arith.constant 0 : index
    %c3 = arith.constant 3 : index
    %c0_14 = arith.constant 0 : index
    %c0_15 = arith.constant 0 : index
    %8 = vector.load %arg3[%c0_13, %c3, %c0_14, %c0_15] : memref<1x4x18x72xbf16, #tpu.memory_space<vmem>>, vector<1x1x18x72xbf16>
    %9 = vector.shape_cast %8 : vector<1x1x18x72xbf16> to vector<18x72xbf16>
    %c0_16 = arith.constant 0 : index
    %c0_17 = arith.constant 0 : index
    %c0_18 = arith.constant 0 : index
    %c0_19 = arith.constant 0 : index
    %10 = vector.load %arg4[%c0_16, %c0_17, %c0_18, %c0_19] : memref<1x1x18x72xbf16, #tpu.memory_space<vmem>>, vector<1x1x18x72xbf16>
    %11 = vector.shape_cast %10 : vector<1x1x18x72xbf16> to vector<18x72xbf16>
    %c0_20 = arith.constant 0 : index
    %c0_21 = arith.constant 0 : index
    %12 = vector.load %arg6[%c0_20, %c0_21] : memref<1x128xf32, #tpu.memory_space<vmem>>, vector<1x128xf32>
    %13 = vector.shape_cast %12 : vector<1x128xf32> to vector<128xf32>
    %c0_22 = arith.constant 0 : index
    %c0_23 = arith.constant 0 : index
    %14 = vector.load %arg7[%c0_22, %c0_23] : memref<1x128xf32, #tpu.memory_space<vmem>>, vector<1x128xf32>
    %15 = vector.shape_cast %14 : vector<1x128xf32> to vector<128xf32>
    %c0_24 = arith.constant 0 : index
    %c0_25 = arith.constant 0 : index
    %16 = vector.load %arg8[%c0_24, %c0_25] : memref<64x128xbf16, #tpu.memory_space<vmem>>, vector<64x128xbf16>
    %c0_26 = arith.constant 0 : index
    %c0_27 = arith.constant 0 : index
    %17 = vector.load %arg9[%c0_26, %c0_27] : memref<1x128xf32, #tpu.memory_space<vmem>>, vector<1x128xf32>
    %18 = vector.shape_cast %17 : vector<1x128xf32> to vector<128xf32>
    %c0_28 = arith.constant 0 : index
    %c0_29 = arith.constant 0 : index
    %19 = vector.load %arg10[%c0_28, %c0_29] : memref<1x128xf32, #tpu.memory_space<vmem>>, vector<1x128xf32>
    %20 = vector.shape_cast %19 : vector<1x128xf32> to vector<128xf32>
    %cst = arith.constant 0.000000e+00 : f32
    %21 = vector.broadcast %cst : f32 to vector<16x128xf32>
    %22 = vector.extract_strided_slice %1 {offsets = [0, 0], sizes = [16, 72], strides = [1, 1]} : vector<18x72xbf16> to vector<16x72xbf16>
    %c0_30 = arith.constant 0 : index
    %c0_31 = arith.constant 0 : index
    %c0_32 = arith.constant 0 : index
    %23 = vector.load %arg5[%c0_30, %c0_31, %c0_32] : memref<9x72x128xbf16, #tpu.memory_space<vmem>>, vector<1x72x128xbf16>
    %24 = vector.shape_cast %23 : vector<1x72x128xbf16> to vector<72x128xbf16>
    %cst_33 = arith.constant dense<0.000000e+00> : vector<16x128xf32>
    %25 = tpu.matmul %22, %24, %cst_33 {dimension_numbers = #tpu.dot_dimension_numbers<[1], [0], [0], [1], [0, 0, 1, 1], [], []>} : vector<16x72xbf16>, vector<72x128xbf16>, vector<16x128xf32> -> vector<16x128xf32>
    %26 = arith.addf %21, %25 : vector<16x128xf32>
    %27 = vector.extract_strided_slice %1 {offsets = [1, 0], sizes = [16, 72], strides = [1, 1]} : vector<18x72xbf16> to vector<16x72xbf16>
    %c1_34 = arith.constant 1 : index
    %c0_35 = arith.constant 0 : index
    %c0_36 = arith.constant 0 : index
    %28 = vector.load %arg5[%c1_34, %c0_35, %c0_36] : memref<9x72x128xbf16, #tpu.memory_space<vmem>>, vector<1x72x128xbf16>
    %29 = vector.shape_cast %28 : vector<1x72x128xbf16> to vector<72x128xbf16>
    %cst_37 = arith.constant dense<0.000000e+00> : vector<16x128xf32>
    %30 = tpu.matmul %27, %29, %cst_37 {dimension_numbers = #tpu.dot_dimension_numbers<[1], [0], [0], [1], [0, 0, 1, 1], [], []>} : vector<16x72xbf16>, vector<72x128xbf16>, vector<16x128xf32> -> vector<16x128xf32>
    %31 = arith.addf %26, %30 : vector<16x128xf32>
    %32 = vector.extract_strided_slice %1 {offsets = [2, 0], sizes = [16, 72], strides = [1, 1]} : vector<18x72xbf16> to vector<16x72xbf16>
    %c2_38 = arith.constant 2 : index
    %c0_39 = arith.constant 0 : index
    %c0_40 = arith.constant 0 : index
    %33 = vector.load %arg5[%c2_38, %c0_39, %c0_40] : memref<9x72x128xbf16, #tpu.memory_space<vmem>>, vector<1x72x128xbf16>
    %34 = vector.shape_cast %33 : vector<1x72x128xbf16> to vector<72x128xbf16>
    %cst_41 = arith.constant dense<0.000000e+00> : vector<16x128xf32>
    %35 = tpu.matmul %32, %34, %cst_41 {dimension_numbers = #tpu.dot_dimension_numbers<[1], [0], [0], [1], [0, 0, 1, 1], [], []>} : vector<16x72xbf16>, vector<72x128xbf16>, vector<16x128xf32> -> vector<16x128xf32>
    %36 = arith.addf %31, %35 : vector<16x128xf32>
    %37 = vector.extract_strided_slice %3 {offsets = [0, 0], sizes = [16, 72], strides = [1, 1]} : vector<18x72xbf16> to vector<16x72xbf16>
    %c3_42 = arith.constant 3 : index
    %c0_43 = arith.constant 0 : index
    %c0_44 = arith.constant 0 : index
    %38 = vector.load %arg5[%c3_42, %c0_43, %c0_44] : memref<9x72x128xbf16, #tpu.memory_space<vmem>>, vector<1x72x128xbf16>
    %39 = vector.shape_cast %38 : vector<1x72x128xbf16> to vector<72x128xbf16>
    %cst_45 = arith.constant dense<0.000000e+00> : vector<16x128xf32>
    %40 = tpu.matmul %37, %39, %cst_45 {dimension_numbers = #tpu.dot_dimension_numbers<[1], [0], [0], [1], [0, 0, 1, 1], [], []>} : vector<16x72xbf16>, vector<72x128xbf16>, vector<16x128xf32> -> vector<16x128xf32>
    %41 = arith.addf %36, %40 : vector<16x128xf32>
    %42 = vector.extract_strided_slice %3 {offsets = [1, 0], sizes = [16, 72], strides = [1, 1]} : vector<18x72xbf16> to vector<16x72xbf16>
    %c4 = arith.constant 4 : index
    %c0_46 = arith.constant 0 : index
    %c0_47 = arith.constant 0 : index
    %43 = vector.load %arg5[%c4, %c0_46, %c0_47] : memref<9x72x128xbf16, #tpu.memory_space<vmem>>, vector<1x72x128xbf16>
    %44 = vector.shape_cast %43 : vector<1x72x128xbf16> to vector<72x128xbf16>
    %cst_48 = arith.constant dense<0.000000e+00> : vector<16x128xf32>
    %45 = tpu.matmul %42, %44, %cst_48 {dimension_numbers = #tpu.dot_dimension_numbers<[1], [0], [0], [1], [0, 0, 1, 1], [], []>} : vector<16x72xbf16>, vector<72x128xbf16>, vector<16x128xf32> -> vector<16x128xf32>
    %46 = arith.addf %41, %45 : vector<16x128xf32>
    %47 = vector.extract_strided_slice %3 {offsets = [2, 0], sizes = [16, 72], strides = [1, 1]} : vector<18x72xbf16> to vector<16x72xbf16>
    %c5 = arith.constant 5 : index
    %c0_49 = arith.constant 0 : index
    %c0_50 = arith.constant 0 : index
    %48 = vector.load %arg5[%c5, %c0_49, %c0_50] : memref<9x72x128xbf16, #tpu.memory_space<vmem>>, vector<1x72x128xbf16>
    %49 = vector.shape_cast %48 : vector<1x72x128xbf16> to vector<72x128xbf16>
    %cst_51 = arith.constant dense<0.000000e+00> : vector<16x128xf32>
    %50 = tpu.matmul %47, %49, %cst_51 {dimension_numbers = #tpu.dot_dimension_numbers<[1], [0], [0], [1], [0, 0, 1, 1], [], []>} : vector<16x72xbf16>, vector<72x128xbf16>, vector<16x128xf32> -> vector<16x128xf32>
    %51 = arith.addf %46, %50 : vector<16x128xf32>
    %52 = vector.extract_strided_slice %5 {offsets = [0, 0], sizes = [16, 72], strides = [1, 1]} : vector<18x72xbf16> to vector<16x72xbf16>
    %c6 = arith.constant 6 : index
    %c0_52 = arith.constant 0 : index
    %c0_53 = arith.constant 0 : index
    %53 = vector.load %arg5[%c6, %c0_52, %c0_53] : memref<9x72x128xbf16, #tpu.memory_space<vmem>>, vector<1x72x128xbf16>
    %54 = vector.shape_cast %53 : vector<1x72x128xbf16> to vector<72x128xbf16>
    %cst_54 = arith.constant dense<0.000000e+00> : vector<16x128xf32>
    %55 = tpu.matmul %52, %54, %cst_54 {dimension_numbers = #tpu.dot_dimension_numbers<[1], [0], [0], [1], [0, 0, 1, 1], [], []>} : vector<16x72xbf16>, vector<72x128xbf16>, vector<16x128xf32> -> vector<16x128xf32>
    %56 = arith.addf %51, %55 : vector<16x128xf32>
    %57 = vector.extract_strided_slice %5 {offsets = [1, 0], sizes = [16, 72], strides = [1, 1]} : vector<18x72xbf16> to vector<16x72xbf16>
    %c7 = arith.constant 7 : index
    %c0_55 = arith.constant 0 : index
    %c0_56 = arith.constant 0 : index
    %58 = vector.load %arg5[%c7, %c0_55, %c0_56] : memref<9x72x128xbf16, #tpu.memory_space<vmem>>, vector<1x72x128xbf16>
    %59 = vector.shape_cast %58 : vector<1x72x128xbf16> to vector<72x128xbf16>
    %cst_57 = arith.constant dense<0.000000e+00> : vector<16x128xf32>
    %60 = tpu.matmul %57, %59, %cst_57 {dimension_numbers = #tpu.dot_dimension_numbers<[1], [0], [0], [1], [0, 0, 1, 1], [], []>} : vector<16x72xbf16>, vector<72x128xbf16>, vector<16x128xf32> -> vector<16x128xf32>
    %61 = arith.addf %56, %60 : vector<16x128xf32>
    %62 = vector.extract_strided_slice %5 {offsets = [2, 0], sizes = [16, 72], strides = [1, 1]} : vector<18x72xbf16> to vector<16x72xbf16>
    %c8 = arith.constant 8 : index
    %c0_58 = arith.constant 0 : index
    %c0_59 = arith.constant 0 : index
    %63 = vector.load %arg5[%c8, %c0_58, %c0_59] : memref<9x72x128xbf16, #tpu.memory_space<vmem>>, vector<1x72x128xbf16>
    %64 = vector.shape_cast %63 : vector<1x72x128xbf16> to vector<72x128xbf16>
    %cst_60 = arith.constant dense<0.000000e+00> : vector<16x128xf32>
    %65 = tpu.matmul %62, %64, %cst_60 {dimension_numbers = #tpu.dot_dimension_numbers<[1], [0], [0], [1], [0, 0, 1, 1], [], []>} : vector<16x72xbf16>, vector<72x128xbf16>, vector<16x128xf32> -> vector<16x128xf32>
    %66 = arith.addf %61, %65 : vector<16x128xf32>
    %67 = vector.shape_cast %13 : vector<128xf32> to vector<1x128xf32>
    %68 = vector.broadcast %67 : vector<1x128xf32> to vector<16x128xf32>
    %69 = arith.mulf %66, %68 : vector<16x128xf32>
    %70 = vector.shape_cast %15 : vector<128xf32> to vector<1x128xf32>
    %71 = vector.broadcast %70 : vector<1x128xf32> to vector<16x128xf32>
    %72 = arith.addf %69, %71 : vector<16x128xf32>
    %cst_61 = arith.constant 0.000000e+00 : f32
    %73 = vector.broadcast %cst_61 : f32 to vector<16x128xf32>
    %74 = arith.maximumf %72, %73 : vector<16x128xf32>
    %75 = vector.shape_cast %74 : vector<16x128xf32> to vector<8x2x128xf32>
    %76 = vector.extract_strided_slice %75 {offsets = [0, 0, 0], sizes = [8, 1, 128], strides = [1, 1, 1]} : vector<8x2x128xf32> to vector<8x1x128xf32>
    %77 = vector.shape_cast %76 : vector<8x1x128xf32> to vector<8x128xf32>
    %78 = vector.extract_strided_slice %75 {offsets = [0, 1, 0], sizes = [8, 1, 128], strides = [1, 1, 1]} : vector<8x2x128xf32> to vector<8x1x128xf32>
    %79 = vector.shape_cast %78 : vector<8x1x128xf32> to vector<8x128xf32>
    %80 = arith.maximumf %77, %79 : vector<8x128xf32>
    %81 = vector.extract_strided_slice %80 {offsets = [0, 0], sizes = [8, 64], strides = [1, 1]} : vector<8x128xf32> to vector<8x64xf32>
    %82 = vector.extract_strided_slice %80 {offsets = [0, 64], sizes = [8, 64], strides = [1, 1]} : vector<8x128xf32> to vector<8x64xf32>
    %83 = arith.maximumf %81, %82 : vector<8x64xf32>
    %84 = arith.truncf %83 : vector<8x64xf32> to vector<8x64xbf16>
    %cst_62 = arith.constant dense<0.000000e+00> : vector<8x128xf32>
    %85 = tpu.matmul %84, %16, %cst_62 {dimension_numbers = #tpu.dot_dimension_numbers<[1], [0], [0], [1], [0, 0, 1, 1], [], []>} : vector<8x64xbf16>, vector<64x128xbf16>, vector<8x128xf32> -> vector<8x128xf32>
    %86 = vector.shape_cast %18 : vector<128xf32> to vector<1x128xf32>
    %87 = vector.broadcast %86 : vector<1x128xf32> to vector<8x128xf32>
    %88 = arith.mulf %85, %87 : vector<8x128xf32>
    %89 = vector.shape_cast %20 : vector<128xf32> to vector<1x128xf32>
    %90 = vector.broadcast %89 : vector<1x128xf32> to vector<8x128xf32>
    %91 = arith.addf %88, %90 : vector<8x128xf32>
    %cst_63 = arith.constant 0.000000e+00 : f32
    %92 = vector.broadcast %cst_63 : f32 to vector<8x128xf32>
    %93 = arith.maximumf %91, %92 : vector<8x128xf32>
    %94 = vector.extract_strided_slice %93 {offsets = [0, 0], sizes = [8, 64], strides = [1, 1]} : vector<8x128xf32> to vector<8x64xf32>
    %95 = vector.extract_strided_slice %93 {offsets = [0, 64], sizes = [8, 64], strides = [1, 1]} : vector<8x128xf32> to vector<8x64xf32>
    %96 = arith.addf %94, %95 : vector<8x64xf32>
    %c0_64 = arith.constant 0 : index
    %c0_65 = arith.constant 0 : index
    %c0_66 = arith.constant 0 : index
    %c0_67 = arith.constant 0 : index
    %97 = vector.load %arg11[%c0_64, %c0_65, %c0_66, %c0_67] : memref<1x4x8x64xf32, #tpu.memory_space<vmem>>, vector<1x1x8x64xf32>
    %98 = vector.shape_cast %97 : vector<1x1x8x64xf32> to vector<8x64xf32>
    %99 = vector.shape_cast %96 : vector<8x64xf32> to vector<1x1x8x64xf32>
    tpu.vector_store %arg11[%c0_64, %c0_65, %c0_66, %c0_67], %99 {strides = array<i32>} : memref<1x4x8x64xf32, #tpu.memory_space<vmem>>, vector<1x1x8x64xf32>,
    %cst_68 = arith.constant 0.000000e+00 : f32
    %100 = vector.broadcast %cst_68 : f32 to vector<16x128xf32>
    %101 = vector.extract_strided_slice %3 {offsets = [0, 0], sizes = [16, 72], strides = [1, 1]} : vector<18x72xbf16> to vector<16x72xbf16>
    %c0_69 = arith.constant 0 : index
    %c0_70 = arith.constant 0 : index
    %c0_71 = arith.constant 0 : index
    %102 = vector.load %arg5[%c0_69, %c0_70, %c0_71] : memref<9x72x128xbf16, #tpu.memory_space<vmem>>, vector<1x72x128xbf16>
    %103 = vector.shape_cast %102 : vector<1x72x128xbf16> to vector<72x128xbf16>
    %cst_72 = arith.constant dense<0.000000e+00> : vector<16x128xf32>
    %104 = tpu.matmul %101, %103, %cst_72 {dimension_numbers = #tpu.dot_dimension_numbers<[1], [0], [0], [1], [0, 0, 1, 1], [], []>} : vector<16x72xbf16>, vector<72x128xbf16>, vector<16x128xf32> -> vector<16x128xf32>
    %105 = arith.addf %100, %104 : vector<16x128xf32>
    %106 = vector.extract_strided_slice %3 {offsets = [1, 0], sizes = [16, 72], strides = [1, 1]} : vector<18x72xbf16> to vector<16x72xbf16>
    %c1_73 = arith.constant 1 : index
    %c0_74 = arith.constant 0 : index
    %c0_75 = arith.constant 0 : index
    %107 = vector.load %arg5[%c1_73, %c0_74, %c0_75] : memref<9x72x128xbf16, #tpu.memory_space<vmem>>, vector<1x72x128xbf16>
    %108 = vector.shape_cast %107 : vector<1x72x128xbf16> to vector<72x128xbf16>
    %cst_76 = arith.constant dense<0.000000e+00> : vector<16x128xf32>
    %109 = tpu.matmul %106, %108, %cst_76 {dimension_numbers = #tpu.dot_dimension_numbers<[1], [0], [0], [1], [0, 0, 1, 1], [], []>} : vector<16x72xbf16>, vector<72x128xbf16>, vector<16x128xf32> -> vector<16x128xf32>
    %110 = arith.addf %105, %109 : vector<16x128xf32>
    %111 = vector.extract_strided_slice %3 {offsets = [2, 0], sizes = [16, 72], strides = [1, 1]} : vector<18x72xbf16> to vector<16x72xbf16>
    %c2_77 = arith.constant 2 : index
    %c0_78 = arith.constant 0 : index
    %c0_79 = arith.constant 0 : index
    %112 = vector.load %arg5[%c2_77, %c0_78, %c0_79] : memref<9x72x128xbf16, #tpu.memory_space<vmem>>, vector<1x72x128xbf16>
    %113 = vector.shape_cast %112 : vector<1x72x128xbf16> to vector<72x128xbf16>
    %cst_80 = arith.constant dense<0.000000e+00> : vector<16x128xf32>
    %114 = tpu.matmul %111, %113, %cst_80 {dimension_numbers = #tpu.dot_dimension_numbers<[1], [0], [0], [1], [0, 0, 1, 1], [], []>} : vector<16x72xbf16>, vector<72x128xbf16>, vector<16x128xf32> -> vector<16x128xf32>
    %115 = arith.addf %110, %114 : vector<16x128xf32>
    %116 = vector.extract_strided_slice %5 {offsets = [0, 0], sizes = [16, 72], strides = [1, 1]} : vector<18x72xbf16> to vector<16x72xbf16>
    %c3_81 = arith.constant 3 : index
    %c0_82 = arith.constant 0 : index
    %c0_83 = arith.constant 0 : index
    %117 = vector.load %arg5[%c3_81, %c0_82, %c0_83] : memref<9x72x128xbf16, #tpu.memory_space<vmem>>, vector<1x72x128xbf16>
    %118 = vector.shape_cast %117 : vector<1x72x128xbf16> to vector<72x128xbf16>
    %cst_84 = arith.constant dense<0.000000e+00> : vector<16x128xf32>
    %119 = tpu.matmul %116, %118, %cst_84 {dimension_numbers = #tpu.dot_dimension_numbers<[1], [0], [0], [1], [0, 0, 1, 1], [], []>} : vector<16x72xbf16>, vector<72x128xbf16>, vector<16x128xf32> -> vector<16x128xf32>
    %120 = arith.addf %115, %119 : vector<16x128xf32>
    %121 = vector.extract_strided_slice %5 {offsets = [1, 0], sizes = [16, 72], strides = [1, 1]} : vector<18x72xbf16> to vector<16x72xbf16>
    %c4_85 = arith.constant 4 : index
    %c0_86 = arith.constant 0 : index
    %c0_87 = arith.constant 0 : index
    %122 = vector.load %arg5[%c4_85, %c0_86, %c0_87] : memref<9x72x128xbf16, #tpu.memory_space<vmem>>, vector<1x72x128xbf16>
    %123 = vector.shape_cast %122 : vector<1x72x128xbf16> to vector<72x128xbf16>
    %cst_88 = arith.constant dense<0.000000e+00> : vector<16x128xf32>
    %124 = tpu.matmul %121, %123, %cst_88 {dimension_numbers = #tpu.dot_dimension_numbers<[1], [0], [0], [1], [0, 0, 1, 1], [], []>} : vector<16x72xbf16>, vector<72x128xbf16>, vector<16x128xf32> -> vector<16x128xf32>
    %125 = arith.addf %120, %124 : vector<16x128xf32>
    %126 = vector.extract_strided_slice %5 {offsets = [2, 0], sizes = [16, 72], strides = [1, 1]} : vector<18x72xbf16> to vector<16x72xbf16>
    %c5_89 = arith.constant 5 : index
    %c0_90 = arith.constant 0 : index
    %c0_91 = arith.constant 0 : index
    %127 = vector.load %arg5[%c5_89, %c0_90, %c0_91] : memref<9x72x128xbf16, #tpu.memory_space<vmem>>, vector<1x72x128xbf16>
    %128 = vector.shape_cast %127 : vector<1x72x128xbf16> to vector<72x128xbf16>
    %cst_92 = arith.constant dense<0.000000e+00> : vector<16x128xf32>
    %129 = tpu.matmul %126, %128, %cst_92 {dimension_numbers = #tpu.dot_dimension_numbers<[1], [0], [0], [1], [0, 0, 1, 1], [], []>} : vector<16x72xbf16>, vector<72x128xbf16>, vector<16x128xf32> -> vector<16x128xf32>
    %130 = arith.addf %125, %129 : vector<16x128xf32>
    %131 = vector.extract_strided_slice %7 {offsets = [0, 0], sizes = [16, 72], strides = [1, 1]} : vector<18x72xbf16> to vector<16x72xbf16>
    %c6_93 = arith.constant 6 : index
    %c0_94 = arith.constant 0 : index
    %c0_95 = arith.constant 0 : index
    %132 = vector.load %arg5[%c6_93, %c0_94, %c0_95] : memref<9x72x128xbf16, #tpu.memory_space<vmem>>, vector<1x72x128xbf16>
    %133 = vector.shape_cast %132 : vector<1x72x128xbf16> to vector<72x128xbf16>
    %cst_96 = arith.constant dense<0.000000e+00> : vector<16x128xf32>
    %134 = tpu.matmul %131, %133, %cst_96 {dimension_numbers = #tpu.dot_dimension_numbers<[1], [0], [0], [1], [0, 0, 1, 1], [], []>} : vector<16x72xbf16>, vector<72x128xbf16>, vector<16x128xf32> -> vector<16x128xf32>
    %135 = arith.addf %130, %134 : vector<16x128xf32>
    %136 = vector.extract_strided_slice %7 {offsets = [1, 0], sizes = [16, 72], strides = [1, 1]} : vector<18x72xbf16> to vector<16x72xbf16>
    %c7_97 = arith.constant 7 : index
    %c0_98 = arith.constant 0 : index
    %c0_99 = arith.constant 0 : index
    %137 = vector.load %arg5[%c7_97, %c0_98, %c0_99] : memref<9x72x128xbf16, #tpu.memory_space<vmem>>, vector<1x72x128xbf16>
    %138 = vector.shape_cast %137 : vector<1x72x128xbf16> to vector<72x128xbf16>
    %cst_100 = arith.constant dense<0.000000e+00> : vector<16x128xf32>
    %139 = tpu.matmul %136, %138, %cst_100 {dimension_numbers = #tpu.dot_dimension_numbers<[1], [0], [0], [1], [0, 0, 1, 1], [], []>} : vector<16x72xbf16>, vector<72x128xbf16>, vector<16x128xf32> -> vector<16x128xf32>
    %140 = arith.addf %135, %139 : vector<16x128xf32>
    %141 = vector.extract_strided_slice %7 {offsets = [2, 0], sizes = [16, 72], strides = [1, 1]} : vector<18x72xbf16> to vector<16x72xbf16>
    %c8_101 = arith.constant 8 : index
    %c0_102 = arith.constant 0 : index
    %c0_103 = arith.constant 0 : index
    %142 = vector.load %arg5[%c8_101, %c0_102, %c0_103] : memref<9x72x128xbf16, #tpu.memory_space<vmem>>, vector<1x72x128xbf16>
    %143 = vector.shape_cast %142 : vector<1x72x128xbf16> to vector<72x128xbf16>
    %cst_104 = arith.constant dense<0.000000e+00> : vector<16x128xf32>
    %144 = tpu.matmul %141, %143, %cst_104 {dimension_numbers = #tpu.dot_dimension_numbers<[1], [0], [0], [1], [0, 0, 1, 1], [], []>} : vector<16x72xbf16>, vector<72x128xbf16>, vector<16x128xf32> -> vector<16x128xf32>
    %145 = arith.addf %140, %144 : vector<16x128xf32>
    %146 = vector.shape_cast %13 : vector<128xf32> to vector<1x128xf32>
    %147 = vector.broadcast %146 : vector<1x128xf32> to vector<16x128xf32>
    %148 = arith.mulf %145, %147 : vector<16x128xf32>
    %149 = vector.shape_cast %15 : vector<128xf32> to vector<1x128xf32>
    %150 = vector.broadcast %149 : vector<1x128xf32> to vector<16x128xf32>
    %151 = arith.addf %148, %150 : vector<16x128xf32>
    %cst_105 = arith.constant 0.000000e+00 : f32
    %152 = vector.broadcast %cst_105 : f32 to vector<16x128xf32>
    %153 = arith.maximumf %151, %152 : vector<16x128xf32>
    %154 = vector.shape_cast %153 : vector<16x128xf32> to vector<8x2x128xf32>
    %155 = vector.extract_strided_slice %154 {offsets = [0, 0, 0], sizes = [8, 1, 128], strides = [1, 1, 1]} : vector<8x2x128xf32> to vector<8x1x128xf32>
    %156 = vector.shape_cast %155 : vector<8x1x128xf32> to vector<8x128xf32>
    %157 = vector.extract_strided_slice %154 {offsets = [0, 1, 0], sizes = [8, 1, 128], strides = [1, 1, 1]} : vector<8x2x128xf32> to vector<8x1x128xf32>
    %158 = vector.shape_cast %157 : vector<8x1x128xf32> to vector<8x128xf32>
    %159 = arith.maximumf %156, %158 : vector<8x128xf32>
    %160 = vector.extract_strided_slice %159 {offsets = [0, 0], sizes = [8, 64], strides = [1, 1]} : vector<8x128xf32> to vector<8x64xf32>
    %161 = vector.extract_strided_slice %159 {offsets = [0, 64], sizes = [8, 64], strides = [1, 1]} : vector<8x128xf32> to vector<8x64xf32>
    %162 = arith.maximumf %160, %161 : vector<8x64xf32>
    %163 = arith.truncf %162 : vector<8x64xf32> to vector<8x64xbf16>
    %cst_106 = arith.constant dense<0.000000e+00> : vector<8x128xf32>
    %164 = tpu.matmul %163, %16, %cst_106 {dimension_numbers = #tpu.dot_dimension_numbers<[1], [0], [0], [1], [0, 0, 1, 1], [], []>} : vector<8x64xbf16>, vector<64x128xbf16>, vector<8x128xf32> -> vector<8x128xf32>
    %165 = vector.shape_cast %18 : vector<128xf32> to vector<1x128xf32>
    %166 = vector.broadcast %165 : vector<1x128xf32> to vector<8x128xf32>
    %167 = arith.mulf %164, %166 : vector<8x128xf32>
    %168 = vector.shape_cast %20 : vector<128xf32> to vector<1x128xf32>
    %169 = vector.broadcast %168 : vector<1x128xf32> to vector<8x128xf32>
    %170 = arith.addf %167, %169 : vector<8x128xf32>
    %cst_107 = arith.constant 0.000000e+00 : f32
    %171 = vector.broadcast %cst_107 : f32 to vector<8x128xf32>
    %172 = arith.maximumf %170, %171 : vector<8x128xf32>
    %173 = vector.extract_strided_slice %172 {offsets = [0, 0], sizes = [8, 64], strides = [1, 1]} : vector<8x128xf32> to vector<8x64xf32>
    %174 = vector.extract_strided_slice %172 {offsets = [0, 64], sizes = [8, 64], strides = [1, 1]} : vector<8x128xf32> to vector<8x64xf32>
    %175 = arith.addf %173, %174 : vector<8x64xf32>
    %c0_108 = arith.constant 0 : index
    %c1_109 = arith.constant 1 : index
    %c0_110 = arith.constant 0 : index
    %c0_111 = arith.constant 0 : index
    %176 = vector.load %arg11[%c0_108, %c1_109, %c0_110, %c0_111] : memref<1x4x8x64xf32, #tpu.memory_space<vmem>>, vector<1x1x8x64xf32>
    %177 = vector.shape_cast %176 : vector<1x1x8x64xf32> to vector<8x64xf32>
    %178 = vector.shape_cast %175 : vector<8x64xf32> to vector<1x1x8x64xf32>
    tpu.vector_store %arg11[%c0_108, %c1_109, %c0_110, %c0_111], %178 {strides = array<i32>} : memref<1x4x8x64xf32, #tpu.memory_space<vmem>>, vector<1x1x8x64xf32>,
    %cst_112 = arith.constant 0.000000e+00 : f32
    %179 = vector.broadcast %cst_112 : f32 to vector<16x128xf32>
    %180 = vector.extract_strided_slice %5 {offsets = [0, 0], sizes = [16, 72], strides = [1, 1]} : vector<18x72xbf16> to vector<16x72xbf16>
    %c0_113 = arith.constant 0 : index
    %c0_114 = arith.constant 0 : index
    %c0_115 = arith.constant 0 : index
    %181 = vector.load %arg5[%c0_113, %c0_114, %c0_115] : memref<9x72x128xbf16, #tpu.memory_space<vmem>>, vector<1x72x128xbf16>
    %182 = vector.shape_cast %181 : vector<1x72x128xbf16> to vector<72x128xbf16>
    %cst_116 = arith.constant dense<0.000000e+00> : vector<16x128xf32>
    %183 = tpu.matmul %180, %182, %cst_116 {dimension_numbers = #tpu.dot_dimension_numbers<[1], [0], [0], [1], [0, 0, 1, 1], [], []>} : vector<16x72xbf16>, vector<72x128xbf16>, vector<16x128xf32> -> vector<16x128xf32>
    %184 = arith.addf %179, %183 : vector<16x128xf32>
    %185 = vector.extract_strided_slice %5 {offsets = [1, 0], sizes = [16, 72], strides = [1, 1]} : vector<18x72xbf16> to vector<16x72xbf16>
    %c1_117 = arith.constant 1 : index
    %c0_118 = arith.constant 0 : index
    %c0_119 = arith.constant 0 : index
    %186 = vector.load %arg5[%c1_117, %c0_118, %c0_119] : memref<9x72x128xbf16, #tpu.memory_space<vmem>>, vector<1x72x128xbf16>
    %187 = vector.shape_cast %186 : vector<1x72x128xbf16> to vector<72x128xbf16>
    %cst_120 = arith.constant dense<0.000000e+00> : vector<16x128xf32>
    %188 = tpu.matmul %185, %187, %cst_120 {dimension_numbers = #tpu.dot_dimension_numbers<[1], [0], [0], [1], [0, 0, 1, 1], [], []>} : vector<16x72xbf16>, vector<72x128xbf16>, vector<16x128xf32> -> vector<16x128xf32>
    %189 = arith.addf %184, %188 : vector<16x128xf32>
    %190 = vector.extract_strided_slice %5 {offsets = [2, 0], sizes = [16, 72], strides = [1, 1]} : vector<18x72xbf16> to vector<16x72xbf16>
    %c2_121 = arith.constant 2 : index
    %c0_122 = arith.constant 0 : index
    %c0_123 = arith.constant 0 : index
    %191 = vector.load %arg5[%c2_121, %c0_122, %c0_123] : memref<9x72x128xbf16, #tpu.memory_space<vmem>>, vector<1x72x128xbf16>
    %192 = vector.shape_cast %191 : vector<1x72x128xbf16> to vector<72x128xbf16>
    %cst_124 = arith.constant dense<0.000000e+00> : vector<16x128xf32>
    %193 = tpu.matmul %190, %192, %cst_124 {dimension_numbers = #tpu.dot_dimension_numbers<[1], [0], [0], [1], [0, 0, 1, 1], [], []>} : vector<16x72xbf16>, vector<72x128xbf16>, vector<16x128xf32> -> vector<16x128xf32>
    %194 = arith.addf %189, %193 : vector<16x128xf32>
    %195 = vector.extract_strided_slice %7 {offsets = [0, 0], sizes = [16, 72], strides = [1, 1]} : vector<18x72xbf16> to vector<16x72xbf16>
    %c3_125 = arith.constant 3 : index
    %c0_126 = arith.constant 0 : index
    %c0_127 = arith.constant 0 : index
    %196 = vector.load %arg5[%c3_125, %c0_126, %c0_127] : memref<9x72x128xbf16, #tpu.memory_space<vmem>>, vector<1x72x128xbf16>
    %197 = vector.shape_cast %196 : vector<1x72x128xbf16> to vector<72x128xbf16>
    %cst_128 = arith.constant dense<0.000000e+00> : vector<16x128xf32>
    %198 = tpu.matmul %195, %197, %cst_128 {dimension_numbers = #tpu.dot_dimension_numbers<[1], [0], [0], [1], [0, 0, 1, 1], [], []>} : vector<16x72xbf16>, vector<72x128xbf16>, vector<16x128xf32> -> vector<16x128xf32>
    %199 = arith.addf %194, %198 : vector<16x128xf32>
    %200 = vector.extract_strided_slice %7 {offsets = [1, 0], sizes = [16, 72], strides = [1, 1]} : vector<18x72xbf16> to vector<16x72xbf16>
    %c4_129 = arith.constant 4 : index
    %c0_130 = arith.constant 0 : index
    %c0_131 = arith.constant 0 : index
    %201 = vector.load %arg5[%c4_129, %c0_130, %c0_131] : memref<9x72x128xbf16, #tpu.memory_space<vmem>>, vector<1x72x128xbf16>
    %202 = vector.shape_cast %201 : vector<1x72x128xbf16> to vector<72x128xbf16>
    %cst_132 = arith.constant dense<0.000000e+00> : vector<16x128xf32>
    %203 = tpu.matmul %200, %202, %cst_132 {dimension_numbers = #tpu.dot_dimension_numbers<[1], [0], [0], [1], [0, 0, 1, 1], [], []>} : vector<16x72xbf16>, vector<72x128xbf16>, vector<16x128xf32> -> vector<16x128xf32>
    %204 = arith.addf %199, %203 : vector<16x128xf32>
    %205 = vector.extract_strided_slice %7 {offsets = [2, 0], sizes = [16, 72], strides = [1, 1]} : vector<18x72xbf16> to vector<16x72xbf16>
    %c5_133 = arith.constant 5 : index
    %c0_134 = arith.constant 0 : index
    %c0_135 = arith.constant 0 : index
    %206 = vector.load %arg5[%c5_133, %c0_134, %c0_135] : memref<9x72x128xbf16, #tpu.memory_space<vmem>>, vector<1x72x128xbf16>
    %207 = vector.shape_cast %206 : vector<1x72x128xbf16> to vector<72x128xbf16>
    %cst_136 = arith.constant dense<0.000000e+00> : vector<16x128xf32>
    %208 = tpu.matmul %205, %207, %cst_136 {dimension_numbers = #tpu.dot_dimension_numbers<[1], [0], [0], [1], [0, 0, 1, 1], [], []>} : vector<16x72xbf16>, vector<72x128xbf16>, vector<16x128xf32> -> vector<16x128xf32>
    %209 = arith.addf %204, %208 : vector<16x128xf32>
    %210 = vector.extract_strided_slice %9 {offsets = [0, 0], sizes = [16, 72], strides = [1, 1]} : vector<18x72xbf16> to vector<16x72xbf16>
    %c6_137 = arith.constant 6 : index
    %c0_138 = arith.constant 0 : index
    %c0_139 = arith.constant 0 : index
    %211 = vector.load %arg5[%c6_137, %c0_138, %c0_139] : memref<9x72x128xbf16, #tpu.memory_space<vmem>>, vector<1x72x128xbf16>
    %212 = vector.shape_cast %211 : vector<1x72x128xbf16> to vector<72x128xbf16>
    %cst_140 = arith.constant dense<0.000000e+00> : vector<16x128xf32>
    %213 = tpu.matmul %210, %212, %cst_140 {dimension_numbers = #tpu.dot_dimension_numbers<[1], [0], [0], [1], [0, 0, 1, 1], [], []>} : vector<16x72xbf16>, vector<72x128xbf16>, vector<16x128xf32> -> vector<16x128xf32>
    %214 = arith.addf %209, %213 : vector<16x128xf32>
    %215 = vector.extract_strided_slice %9 {offsets = [1, 0], sizes = [16, 72], strides = [1, 1]} : vector<18x72xbf16> to vector<16x72xbf16>
    %c7_141 = arith.constant 7 : index
    %c0_142 = arith.constant 0 : index
    %c0_143 = arith.constant 0 : index
    %216 = vector.load %arg5[%c7_141, %c0_142, %c0_143] : memref<9x72x128xbf16, #tpu.memory_space<vmem>>, vector<1x72x128xbf16>
    %217 = vector.shape_cast %216 : vector<1x72x128xbf16> to vector<72x128xbf16>
    %cst_144 = arith.constant dense<0.000000e+00> : vector<16x128xf32>
    %218 = tpu.matmul %215, %217, %cst_144 {dimension_numbers = #tpu.dot_dimension_numbers<[1], [0], [0], [1], [0, 0, 1, 1], [], []>} : vector<16x72xbf16>, vector<72x128xbf16>, vector<16x128xf32> -> vector<16x128xf32>
    %219 = arith.addf %214, %218 : vector<16x128xf32>
    %220 = vector.extract_strided_slice %9 {offsets = [2, 0], sizes = [16, 72], strides = [1, 1]} : vector<18x72xbf16> to vector<16x72xbf16>
    %c8_145 = arith.constant 8 : index
    %c0_146 = arith.constant 0 : index
    %c0_147 = arith.constant 0 : index
    %221 = vector.load %arg5[%c8_145, %c0_146, %c0_147] : memref<9x72x128xbf16, #tpu.memory_space<vmem>>, vector<1x72x128xbf16>
    %222 = vector.shape_cast %221 : vector<1x72x128xbf16> to vector<72x128xbf16>
    %cst_148 = arith.constant dense<0.000000e+00> : vector<16x128xf32>
    %223 = tpu.matmul %220, %222, %cst_148 {dimension_numbers = #tpu.dot_dimension_numbers<[1], [0], [0], [1], [0, 0, 1, 1], [], []>} : vector<16x72xbf16>, vector<72x128xbf16>, vector<16x128xf32> -> vector<16x128xf32>
    %224 = arith.addf %219, %223 : vector<16x128xf32>
    %225 = vector.shape_cast %13 : vector<128xf32> to vector<1x128xf32>
    %226 = vector.broadcast %225 : vector<1x128xf32> to vector<16x128xf32>
    %227 = arith.mulf %224, %226 : vector<16x128xf32>
    %228 = vector.shape_cast %15 : vector<128xf32> to vector<1x128xf32>
    %229 = vector.broadcast %228 : vector<1x128xf32> to vector<16x128xf32>
    %230 = arith.addf %227, %229 : vector<16x128xf32>
    %cst_149 = arith.constant 0.000000e+00 : f32
    %231 = vector.broadcast %cst_149 : f32 to vector<16x128xf32>
    %232 = arith.maximumf %230, %231 : vector<16x128xf32>
    %233 = vector.shape_cast %232 : vector<16x128xf32> to vector<8x2x128xf32>
    %234 = vector.extract_strided_slice %233 {offsets = [0, 0, 0], sizes = [8, 1, 128], strides = [1, 1, 1]} : vector<8x2x128xf32> to vector<8x1x128xf32>
    %235 = vector.shape_cast %234 : vector<8x1x128xf32> to vector<8x128xf32>
    %236 = vector.extract_strided_slice %233 {offsets = [0, 1, 0], sizes = [8, 1, 128], strides = [1, 1, 1]} : vector<8x2x128xf32> to vector<8x1x128xf32>
    %237 = vector.shape_cast %236 : vector<8x1x128xf32> to vector<8x128xf32>
    %238 = arith.maximumf %235, %237 : vector<8x128xf32>
    %239 = vector.extract_strided_slice %238 {offsets = [0, 0], sizes = [8, 64], strides = [1, 1]} : vector<8x128xf32> to vector<8x64xf32>
    %240 = vector.extract_strided_slice %238 {offsets = [0, 64], sizes = [8, 64], strides = [1, 1]} : vector<8x128xf32> to vector<8x64xf32>
    %241 = arith.maximumf %239, %240 : vector<8x64xf32>
    %242 = arith.truncf %241 : vector<8x64xf32> to vector<8x64xbf16>
    %cst_150 = arith.constant dense<0.000000e+00> : vector<8x128xf32>
    %243 = tpu.matmul %242, %16, %cst_150 {dimension_numbers = #tpu.dot_dimension_numbers<[1], [0], [0], [1], [0, 0, 1, 1], [], []>} : vector<8x64xbf16>, vector<64x128xbf16>, vector<8x128xf32> -> vector<8x128xf32>
    %244 = vector.shape_cast %18 : vector<128xf32> to vector<1x128xf32>
    %245 = vector.broadcast %244 : vector<1x128xf32> to vector<8x128xf32>
    %246 = arith.mulf %243, %245 : vector<8x128xf32>
    %247 = vector.shape_cast %20 : vector<128xf32> to vector<1x128xf32>
    %248 = vector.broadcast %247 : vector<1x128xf32> to vector<8x128xf32>
    %249 = arith.addf %246, %248 : vector<8x128xf32>
    %cst_151 = arith.constant 0.000000e+00 : f32
    %250 = vector.broadcast %cst_151 : f32 to vector<8x128xf32>
    %251 = arith.maximumf %249, %250 : vector<8x128xf32>
    %252 = vector.extract_strided_slice %251 {offsets = [0, 0], sizes = [8, 64], strides = [1, 1]} : vector<8x128xf32> to vector<8x64xf32>
    %253 = vector.extract_strided_slice %251 {offsets = [0, 64], sizes = [8, 64], strides = [1, 1]} : vector<8x128xf32> to vector<8x64xf32>
    %254 = arith.addf %252, %253 : vector<8x64xf32>
    %c0_152 = arith.constant 0 : index
    %c2_153 = arith.constant 2 : index
    %c0_154 = arith.constant 0 : index
    %c0_155 = arith.constant 0 : index
    %255 = vector.load %arg11[%c0_152, %c2_153, %c0_154, %c0_155] : memref<1x4x8x64xf32, #tpu.memory_space<vmem>>, vector<1x1x8x64xf32>
    %256 = vector.shape_cast %255 : vector<1x1x8x64xf32> to vector<8x64xf32>
    %257 = vector.shape_cast %254 : vector<8x64xf32> to vector<1x1x8x64xf32>
    tpu.vector_store %arg11[%c0_152, %c2_153, %c0_154, %c0_155], %257 {strides = array<i32>} : memref<1x4x8x64xf32, #tpu.memory_space<vmem>>, vector<1x1x8x64xf32>,
    %cst_156 = arith.constant 0.000000e+00 : f32
    %258 = vector.broadcast %cst_156 : f32 to vector<16x128xf32>
    %259 = vector.extract_strided_slice %7 {offsets = [0, 0], sizes = [16, 72], strides = [1, 1]} : vector<18x72xbf16> to vector<16x72xbf16>
    %c0_157 = arith.constant 0 : index
    %c0_158 = arith.constant 0 : index
    %c0_159 = arith.constant 0 : index
    %260 = vector.load %arg5[%c0_157, %c0_158, %c0_159] : memref<9x72x128xbf16, #tpu.memory_space<vmem>>, vector<1x72x128xbf16>
    %261 = vector.shape_cast %260 : vector<1x72x128xbf16> to vector<72x128xbf16>
    %cst_160 = arith.constant dense<0.000000e+00> : vector<16x128xf32>
    %262 = tpu.matmul %259, %261, %cst_160 {dimension_numbers = #tpu.dot_dimension_numbers<[1], [0], [0], [1], [0, 0, 1, 1], [], []>} : vector<16x72xbf16>, vector<72x128xbf16>, vector<16x128xf32> -> vector<16x128xf32>
    %263 = arith.addf %258, %262 : vector<16x128xf32>
    %264 = vector.extract_strided_slice %7 {offsets = [1, 0], sizes = [16, 72], strides = [1, 1]} : vector<18x72xbf16> to vector<16x72xbf16>
    %c1_161 = arith.constant 1 : index
    %c0_162 = arith.constant 0 : index
    %c0_163 = arith.constant 0 : index
    %265 = vector.load %arg5[%c1_161, %c0_162, %c0_163] : memref<9x72x128xbf16, #tpu.memory_space<vmem>>, vector<1x72x128xbf16>
    %266 = vector.shape_cast %265 : vector<1x72x128xbf16> to vector<72x128xbf16>
    %cst_164 = arith.constant dense<0.000000e+00> : vector<16x128xf32>
    %267 = tpu.matmul %264, %266, %cst_164 {dimension_numbers = #tpu.dot_dimension_numbers<[1], [0], [0], [1], [0, 0, 1, 1], [], []>} : vector<16x72xbf16>, vector<72x128xbf16>, vector<16x128xf32> -> vector<16x128xf32>
    %268 = arith.addf %263, %267 : vector<16x128xf32>
    %269 = vector.extract_strided_slice %7 {offsets = [2, 0], sizes = [16, 72], strides = [1, 1]} : vector<18x72xbf16> to vector<16x72xbf16>
    %c2_165 = arith.constant 2 : index
    %c0_166 = arith.constant 0 : index
    %c0_167 = arith.constant 0 : index
    %270 = vector.load %arg5[%c2_165, %c0_166, %c0_167] : memref<9x72x128xbf16, #tpu.memory_space<vmem>>, vector<1x72x128xbf16>
    %271 = vector.shape_cast %270 : vector<1x72x128xbf16> to vector<72x128xbf16>
    %cst_168 = arith.constant dense<0.000000e+00> : vector<16x128xf32>
    %272 = tpu.matmul %269, %271, %cst_168 {dimension_numbers = #tpu.dot_dimension_numbers<[1], [0], [0], [1], [0, 0, 1, 1], [], []>} : vector<16x72xbf16>, vector<72x128xbf16>, vector<16x128xf32> -> vector<16x128xf32>
    %273 = arith.addf %268, %272 : vector<16x128xf32>
    %274 = vector.extract_strided_slice %9 {offsets = [0, 0], sizes = [16, 72], strides = [1, 1]} : vector<18x72xbf16> to vector<16x72xbf16>
    %c3_169 = arith.constant 3 : index
    %c0_170 = arith.constant 0 : index
    %c0_171 = arith.constant 0 : index
    %275 = vector.load %arg5[%c3_169, %c0_170, %c0_171] : memref<9x72x128xbf16, #tpu.memory_space<vmem>>, vector<1x72x128xbf16>
    %276 = vector.shape_cast %275 : vector<1x72x128xbf16> to vector<72x128xbf16>
    %cst_172 = arith.constant dense<0.000000e+00> : vector<16x128xf32>
    %277 = tpu.matmul %274, %276, %cst_172 {dimension_numbers = #tpu.dot_dimension_numbers<[1], [0], [0], [1], [0, 0, 1, 1], [], []>} : vector<16x72xbf16>, vector<72x128xbf16>, vector<16x128xf32> -> vector<16x128xf32>
    %278 = arith.addf %273, %277 : vector<16x128xf32>
    %279 = vector.extract_strided_slice %9 {offsets = [1, 0], sizes = [16, 72], strides = [1, 1]} : vector<18x72xbf16> to vector<16x72xbf16>
    %c4_173 = arith.constant 4 : index
    %c0_174 = arith.constant 0 : index
    %c0_175 = arith.constant 0 : index
    %280 = vector.load %arg5[%c4_173, %c0_174, %c0_175] : memref<9x72x128xbf16, #tpu.memory_space<vmem>>, vector<1x72x128xbf16>
    %281 = vector.shape_cast %280 : vector<1x72x128xbf16> to vector<72x128xbf16>
    %cst_176 = arith.constant dense<0.000000e+00> : vector<16x128xf32>
    %282 = tpu.matmul %279, %281, %cst_176 {dimension_numbers = #tpu.dot_dimension_numbers<[1], [0], [0], [1], [0, 0, 1, 1], [], []>} : vector<16x72xbf16>, vector<72x128xbf16>, vector<16x128xf32> -> vector<16x128xf32>
    %283 = arith.addf %278, %282 : vector<16x128xf32>
    %284 = vector.extract_strided_slice %9 {offsets = [2, 0], sizes = [16, 72], strides = [1, 1]} : vector<18x72xbf16> to vector<16x72xbf16>
    %c5_177 = arith.constant 5 : index
    %c0_178 = arith.constant 0 : index
    %c0_179 = arith.constant 0 : index
    %285 = vector.load %arg5[%c5_177, %c0_178, %c0_179] : memref<9x72x128xbf16, #tpu.memory_space<vmem>>, vector<1x72x128xbf16>
    %286 = vector.shape_cast %285 : vector<1x72x128xbf16> to vector<72x128xbf16>
    %cst_180 = arith.constant dense<0.000000e+00> : vector<16x128xf32>
    %287 = tpu.matmul %284, %286, %cst_180 {dimension_numbers = #tpu.dot_dimension_numbers<[1], [0], [0], [1], [0, 0, 1, 1], [], []>} : vector<16x72xbf16>, vector<72x128xbf16>, vector<16x128xf32> -> vector<16x128xf32>
    %288 = arith.addf %283, %287 : vector<16x128xf32>
    %289 = vector.extract_strided_slice %11 {offsets = [0, 0], sizes = [16, 72], strides = [1, 1]} : vector<18x72xbf16> to vector<16x72xbf16>
    %c6_181 = arith.constant 6 : index
    %c0_182 = arith.constant 0 : index
    %c0_183 = arith.constant 0 : index
    %290 = vector.load %arg5[%c6_181, %c0_182, %c0_183] : memref<9x72x128xbf16, #tpu.memory_space<vmem>>, vector<1x72x128xbf16>
    %291 = vector.shape_cast %290 : vector<1x72x128xbf16> to vector<72x128xbf16>
    %cst_184 = arith.constant dense<0.000000e+00> : vector<16x128xf32>
    %292 = tpu.matmul %289, %291, %cst_184 {dimension_numbers = #tpu.dot_dimension_numbers<[1], [0], [0], [1], [0, 0, 1, 1], [], []>} : vector<16x72xbf16>, vector<72x128xbf16>, vector<16x128xf32> -> vector<16x128xf32>
    %293 = arith.addf %288, %292 : vector<16x128xf32>
    %294 = vector.extract_strided_slice %11 {offsets = [1, 0], sizes = [16, 72], strides = [1, 1]} : vector<18x72xbf16> to vector<16x72xbf16>
    %c7_185 = arith.constant 7 : index
    %c0_186 = arith.constant 0 : index
    %c0_187 = arith.constant 0 : index
    %295 = vector.load %arg5[%c7_185, %c0_186, %c0_187] : memref<9x72x128xbf16, #tpu.memory_space<vmem>>, vector<1x72x128xbf16>
    %296 = vector.shape_cast %295 : vector<1x72x128xbf16> to vector<72x128xbf16>
    %cst_188 = arith.constant dense<0.000000e+00> : vector<16x128xf32>
    %297 = tpu.matmul %294, %296, %cst_188 {dimension_numbers = #tpu.dot_dimension_numbers<[1], [0], [0], [1], [0, 0, 1, 1], [], []>} : vector<16x72xbf16>, vector<72x128xbf16>, vector<16x128xf32> -> vector<16x128xf32>
    %298 = arith.addf %293, %297 : vector<16x128xf32>
    %299 = vector.extract_strided_slice %11 {offsets = [2, 0], sizes = [16, 72], strides = [1, 1]} : vector<18x72xbf16> to vector<16x72xbf16>
    %c8_189 = arith.constant 8 : index
    %c0_190 = arith.constant 0 : index
    %c0_191 = arith.constant 0 : index
    %300 = vector.load %arg5[%c8_189, %c0_190, %c0_191] : memref<9x72x128xbf16, #tpu.memory_space<vmem>>, vector<1x72x128xbf16>
    %301 = vector.shape_cast %300 : vector<1x72x128xbf16> to vector<72x128xbf16>
    %cst_192 = arith.constant dense<0.000000e+00> : vector<16x128xf32>
    %302 = tpu.matmul %299, %301, %cst_192 {dimension_numbers = #tpu.dot_dimension_numbers<[1], [0], [0], [1], [0, 0, 1, 1], [], []>} : vector<16x72xbf16>, vector<72x128xbf16>, vector<16x128xf32> -> vector<16x128xf32>
    %303 = arith.addf %298, %302 : vector<16x128xf32>
    %304 = vector.shape_cast %13 : vector<128xf32> to vector<1x128xf32>
    %305 = vector.broadcast %304 : vector<1x128xf32> to vector<16x128xf32>
    %306 = arith.mulf %303, %305 : vector<16x128xf32>
    %307 = vector.shape_cast %15 : vector<128xf32> to vector<1x128xf32>
    %308 = vector.broadcast %307 : vector<1x128xf32> to vector<16x128xf32>
    %309 = arith.addf %306, %308 : vector<16x128xf32>
    %cst_193 = arith.constant 0.000000e+00 : f32
    %310 = vector.broadcast %cst_193 : f32 to vector<16x128xf32>
    %311 = arith.maximumf %309, %310 : vector<16x128xf32>
    %312 = vector.shape_cast %311 : vector<16x128xf32> to vector<8x2x128xf32>
    %313 = vector.extract_strided_slice %312 {offsets = [0, 0, 0], sizes = [8, 1, 128], strides = [1, 1, 1]} : vector<8x2x128xf32> to vector<8x1x128xf32>
    %314 = vector.shape_cast %313 : vector<8x1x128xf32> to vector<8x128xf32>
    %315 = vector.extract_strided_slice %312 {offsets = [0, 1, 0], sizes = [8, 1, 128], strides = [1, 1, 1]} : vector<8x2x128xf32> to vector<8x1x128xf32>
    %316 = vector.shape_cast %315 : vector<8x1x128xf32> to vector<8x128xf32>
    %317 = arith.maximumf %314, %316 : vector<8x128xf32>
    %318 = vector.extract_strided_slice %317 {offsets = [0, 0], sizes = [8, 64], strides = [1, 1]} : vector<8x128xf32> to vector<8x64xf32>
    %319 = vector.extract_strided_slice %317 {offsets = [0, 64], sizes = [8, 64], strides = [1, 1]} : vector<8x128xf32> to vector<8x64xf32>
    %320 = arith.maximumf %318, %319 : vector<8x64xf32>
    %321 = arith.truncf %320 : vector<8x64xf32> to vector<8x64xbf16>
    %cst_194 = arith.constant dense<0.000000e+00> : vector<8x128xf32>
    %322 = tpu.matmul %321, %16, %cst_194 {dimension_numbers = #tpu.dot_dimension_numbers<[1], [0], [0], [1], [0, 0, 1, 1], [], []>} : vector<8x64xbf16>, vector<64x128xbf16>, vector<8x128xf32> -> vector<8x128xf32>
    %323 = vector.shape_cast %18 : vector<128xf32> to vector<1x128xf32>
    %324 = vector.broadcast %323 : vector<1x128xf32> to vector<8x128xf32>
    %325 = arith.mulf %322, %324 : vector<8x128xf32>
    %326 = vector.shape_cast %20 : vector<128xf32> to vector<1x128xf32>
    %327 = vector.broadcast %326 : vector<1x128xf32> to vector<8x128xf32>
    %328 = arith.addf %325, %327 : vector<8x128xf32>
    %cst_195 = arith.constant 0.000000e+00 : f32
    %329 = vector.broadcast %cst_195 : f32 to vector<8x128xf32>
    %330 = arith.maximumf %328, %329 : vector<8x128xf32>
    %331 = vector.extract_strided_slice %330 {offsets = [0, 0], sizes = [8, 64], strides = [1, 1]} : vector<8x128xf32> to vector<8x64xf32>
    %332 = vector.extract_strided_slice %330 {offsets = [0, 64], sizes = [8, 64], strides = [1, 1]} : vector<8x128xf32> to vector<8x64xf32>
    %333 = arith.addf %331, %332 : vector<8x64xf32>
    %c0_196 = arith.constant 0 : index
    %c3_197 = arith.constant 3 : index
    %c0_198 = arith.constant 0 : index
    %c0_199 = arith.constant 0 : index
    %334 = vector.load %arg11[%c0_196, %c3_197, %c0_198, %c0_199] : memref<1x4x8x64xf32, #tpu.memory_space<vmem>>, vector<1x1x8x64xf32>
    %335 = vector.shape_cast %334 : vector<1x1x8x64xf32> to vector<8x64xf32>
    %336 = vector.shape_cast %333 : vector<8x64xf32> to vector<1x1x8x64xf32>
    tpu.vector_store %arg11[%c0_196, %c3_197, %c0_198, %c0_199], %336 {strides = array<i32>} : memref<1x4x8x64xf32, #tpu.memory_space<vmem>>, vector<1x1x8x64xf32>,
    return
  }
  func.func @transform_0(%arg0: i32, %arg1: i32) -> (i32, i32, i32, i32) {
    %c4_i32 = arith.constant 4 : i32
    %0 = arith.muli %arg1, %c4_i32 : i32
    %c1_i32 = arith.constant 1 : i32
    %1 = arith.subi %0, %c1_i32 : i32
    %c0_i32 = arith.constant 0 : i32
    %2 = arith.maxsi %1, %c0_i32 : i32
    %c0_i32_0 = arith.constant 0 : i32
    %c0_i32_1 = arith.constant 0 : i32
    %c0_i32_2 = arith.constant 0 : i32
    return %arg0, %2, %c0_i32_0, %c0_i32_1 : i32, i32, i32, i32
  }
  func.func @transform_1(%arg0: i32, %arg1: i32) -> (i32, i32, i32, i32) {
    %c0_i32 = arith.constant 0 : i32
    %c0_i32_0 = arith.constant 0 : i32
    %c0_i32_1 = arith.constant 0 : i32
    return %arg0, %arg1, %c0_i32, %c0_i32_0 : i32, i32, i32, i32
  }
  func.func @transform_2(%arg0: i32, %arg1: i32) -> (i32, i32, i32, i32) {
    %c4_i32 = arith.constant 4 : i32
    %0 = arith.muli %arg1, %c4_i32 : i32
    %c4_i32_0 = arith.constant 4 : i32
    %1 = arith.addi %0, %c4_i32_0 : i32
    %c3_i32 = arith.constant 3 : i32
    %2 = arith.minsi %1, %c3_i32 : i32
    %c0_i32 = arith.constant 0 : i32
    %c0_i32_1 = arith.constant 0 : i32
    %c0_i32_2 = arith.constant 0 : i32
    return %arg0, %2, %c0_i32, %c0_i32_1 : i32, i32, i32, i32
  }
  func.func @transform_3(%arg0: i32, %arg1: i32) -> (i32, i32, i32) {
    %c0_i32 = arith.constant 0 : i32
    %c0_i32_0 = arith.constant 0 : i32
    %c0_i32_1 = arith.constant 0 : i32
    %c0_i32_2 = arith.constant 0 : i32
    return %c0_i32, %c0_i32_0, %c0_i32_1 : i32, i32, i32
  }
  func.func @transform_4(%arg0: i32, %arg1: i32) -> (i32, i32) {
    %c0_i32 = arith.constant 0 : i32
    %c0_i32_0 = arith.constant 0 : i32
    %c0_i32_1 = arith.constant 0 : i32
    return %c0_i32, %c0_i32_0 : i32, i32
  }
  func.func @transform_5(%arg0: i32, %arg1: i32) -> (i32, i32) {
    %c0_i32 = arith.constant 0 : i32
    %c0_i32_0 = arith.constant 0 : i32
    %c0_i32_1 = arith.constant 0 : i32
    return %c0_i32, %c0_i32_0 : i32, i32
  }
  func.func @transform_6(%arg0: i32, %arg1: i32) -> (i32, i32) {
    %c0_i32 = arith.constant 0 : i32
    %c0_i32_0 = arith.constant 0 : i32
    %c0_i32_1 = arith.constant 0 : i32
    return %c0_i32, %c0_i32_0 : i32, i32
  }
  func.func @transform_7(%arg0: i32, %arg1: i32) -> (i32, i32) {
    %c0_i32 = arith.constant 0 : i32
    %c0_i32_0 = arith.constant 0 : i32
    %c0_i32_1 = arith.constant 0 : i32
    return %c0_i32, %c0_i32_0 : i32, i32
  }
  func.func @transform_8(%arg0: i32, %arg1: i32) -> (i32, i32) {
    %c0_i32 = arith.constant 0 : i32
    %c0_i32_0 = arith.constant 0 : i32
    %c0_i32_1 = arith.constant 0 : i32
    return %c0_i32, %c0_i32_0 : i32, i32
  }
  func.func @transform_9(%arg0: i32, %arg1: i32) -> (i32, i32, i32, i32) {
    %c0_i32 = arith.constant 0 : i32
    %c0_i32_0 = arith.constant 0 : i32
    %c0_i32_1 = arith.constant 0 : i32
    return %arg0, %arg1, %c0_i32, %c0_i32_0 : i32, i32, i32, i32
  }
}

</mosaic_0001>

<bundles_post_ra>
// kernel: tpu_custom_call.1
= control target key start
LH: loop header
LB: loop body
LE: loop exit
PB: predicated region body
PF: predicated region fallthrough
CT: control target
= control target key end

     0   :  { %14 = vsyncpa [#allocation3], 0  ;;  %s5285_s0 = inlined_call_operand.vmem [shape: bf16[2,4,18,72], index: 0, kind: input, shape index: {}]   ;;  %s5286_s1 = inlined_call_operand.vmem [shape: bf16[2,4,18,72], index: 1, kind: input, shape index: {}]   ;;  %s5287_s2 = inlined_call_operand.vmem [shape: bf16[2,4,18,72], index: 2, kind: input, shape index: {}]   ;;  %s5288_s3 = inlined_call_operand.hbm [shape: bf16[9,72,128], index: 3, kind: input, shape index: {}]   ;;  %s5289_s4 = inlined_call_operand.vmem [shape: f32[1,128], index: 4, kind: input, shape index: {}]   ;;  %s5290_s5 = inlined_call_operand.vmem [shape: f32[1,128], index: 5, kind: input, shape index: {}]   ;;  %s5291_s6 = inlined_call_operand.vmem [shape: bf16[64,128], index: 6, kind: input, shape index: {}]   ;;  %s5292_s7 = inlined_call_operand.vmem [shape: f32[1,128], index: 7, kind: input, shape index: {}]   ;;  %s5293_s8 = inlined_call_operand.vmem [shape: f32[1,128], index: 8, kind: input, shape index: {}]   ;;  %s5294_s9 = inlined_call_operand.hbm [shape: f32[2,4,8,64], index: 9, kind: output, shape index: {}]  }
   0x1   :  { %15 = vsyncpa [#allocation4], 0 }
   0x2   :  { %17 = vsyncpa [#allocation4 + $0x1], 0  ;;  %s4735_s30 = smov 0   ;;  %s4737_s10 = smov 0  }
   0x3   :  { %s4739_s11 = smov 0   ;;  %s4741_s12 = smov 0  }
   0x4   :  { %s4743_s13 = smov 0   ;;  %s4745_s14 = smov 0  }
   0x5 LB: > { %s3527_s15 = sadd.s32 4294967295, %s4677_s14   ;;  %s3528_s16 = sadd.s32 4294967294, %s4677_s14   ;;  %s4677_s14 = sphi %s4745_s14, %s23_s14   ;;  %s4673_s13 = sphi %s4743_s13, %s5301_s13   ;;  %s4669_s12 = sphi %s4741_s12, %s5300_s12   ;;  %s4665_s11 = sphi %s4739_s11, %s5299_s11   ;;  %s4661_s10 = sphi %s4737_s10, %s5298_s10   ;;  %s4657_s30 = sphi %s4735_s30, %s5297_s30  }
   0x6   : > { %s35_s17 = sadd.s32 1, %s4673_s13  ;;  %s270_s18 = sadd.s32 1, %s4665_s11 }
   0x7   : > { %p37_p0 = scmp.ge.s32.totalorder %s35_s17, 2  ;;  %p280_p1 = scmp.ne.s32.totalorder %s4665_s11, %s4661_s10 }
   0x8   : > { %p281_p2 = scmp.eq.s32.totalorder %s3527_s15, 1  ;;  %p286_p3 = scmp.ne.s32.totalorder %s4661_s10, %s4657_s30 }
   0x9   : > { %s5303_s17 = smov (%p37_p0, %s35_s17), 0  ;;  %p287_p5 = scmp.eq.s32.totalorder %s3528_s16, 1 }
   0xa   : > { %p4775_p4 = por %p281_p2, %p280_p1  ;;  %s265_s20 = ssub.s32 %s4673_s13, %s5303_s17 }
   0xb   : > { %p3529_p6 = scmp.ge.s32.totalorder %s4677_s14, 1  ;;  %p268_p7 = scmp.eq.s32.totalorder %s265_s20, 0 }
   0xc   : > { %p4782_p8 = por %p287_p5, %p286_p3  ;;  %p294_p9 = scmp.lt.s32.totalorder %s4677_s14, 3 }
   0xd   : > { %s4788_s22 = scalar_select %p268_p7, %s4665_s11, %s270_s18  }
   0xe   : > { %p295_p10 = pnand %p3529_p6, %p294_p9  ;;  %p4416_p11 = scmp.eq.s32.totalorder %s3527_s15, 0 }
   0xf   : > { %s305_s25 = sshll.u32 %s5288_s3, 4  ;;  %s4679_s26 = smov [#allocation2]   ;;  %s306_s25 = int_to_ptr.hbm [resolvable:$true] %s305_s25 }
  0x10   : > { %p4408_p12 = pneg %p295_p10  ;;  %s307_s27 = sshll.u32 %s4679_s26, 4  ;;  %s308_s27 = int_to_ptr.vmem [resolvable:$true] %s307_s27 }
  0x11   : > { %s4680_s28 = smov 64   ;;  %s4681_s29 = smov 4  }
  0x12   : > { %p4409_p13 = pnand %p4416_p11, %p4408_p12  ;;  %392 = sbr.rel (%p295_p10) target bundleno = 1600 (0x640), region = 56 }
  0x14   : > { %4411 = dma.hbm_to_vmem [thread:$0]  (!%p4409_p13), %s306_s25, 5184, %s308_s27, [#allocation3], %s4680_s28, %s4680_s28, %s4681_s29  }
  0x17   : > { %4648 = dma.done.wait (%p4416_p11), [#allocation3], 5184  }
  0x18   : > { %4650 = vsyncadd (%p4416_p11), [#allocation3], 4294962112  ;;  %p464_p0 = scmp.lt.s32.totalorder %s4669_s12, 1  ;;  %v558_v0 = vld [vmem:[#allocation2 + $0x44] sm:$0xf]  ;;  %vm611_vm0 = vcmask 1043456  }
  0x19   : > { %v548_v1 = vld [vmem:[#allocation2 + $0x20] sm:$0xf]  ;;  %v684_v2 = vld [vmem:[#allocation2 + $0x68] sm:$0xf]  ;;  %v597_v3 = vunpack.c.l.b16 %v558_v0  ;;  %v747_v6 = vld [vmem:[#allocation2 + $0x8c] sm:$0xf] }
  0x1a   : > { %s465_s15 = scalar_select %p464_p0, %s4669_s12, 1  ;;  %v646_v4 = vunpack.c.l.b16 %v548_v1  ;;  %v706_v5 = vunpack.c.l.b16 %v684_v2  ;;  %v770_v7 = vunpack.c.l.b16 %v747_v6  ;;  %v4262_v16 = vld [vmem:[#allocation2 + $0x3c] sm:$0xff]  ;;  %v4270_v19 = vld [vmem:[#allocation2 + $0x84] sm:$0xff]  ;;  %v4261_v22 = vld [vmem:[#allocation2 + $0x34] sm:$0xff]  ;;  %vm567_vm1 = vsmask.f32 7424 }
  0x1b   : > { %v602_v8 = vpack.c.b16 %v597_v3, %v597_v3  ;;  %v4258_v17 = vld [vmem:[#allocation2 + $0x18] sm:$0xff]  ;;  %v4266_v18 = vld [vmem:[#allocation2 + $0x60] sm:$0xff]  ;;  %v4257_v24 = vld [vmem:[#allocation2 + $0x10] sm:$0xff]  ;;  %vm685_vm2 = vcmask 1046528   ;;  %vm607_vm3 = vcmask 588800   ;;  %s4682_s18 = smov 64  }
  0x1c   : > { %s4795_s16 = smul.u32 48, %s465_s15  ;;  %v651_v9 = vpack.c.b16 %v646_v4, %v646_v4  ;;  %v711_v10 = vpack.c.b16 %v706_v5, %v706_v5  ;;  %v775_v11 = vpack.c.b16 %v770_v7, %v770_v7  ;;  %v811_v25 = vld [vmem:[#allocation2 + $0xb0] sm:$0xf]  ;;  %v946_v26 = vld [vmem:[#allocation2 + $0xf8] sm:$0xf]  ;;  %v4269_v29 = vld [vmem:[#allocation2 + $0x7c] sm:$0xff] }
  0x1d   : > { %v613_v12 = vsel %vm611_vm0, %v602_v8, 0  ;;  %v4265_v28 = vld [vmem:[#allocation2 + $0x58] sm:$0xff]  ;;  %v843_v32 = vunpack.c.l.b16 %v811_v25  ;;  %v969_v33 = vunpack.c.l.b16 %v946_v26  ;;  %v884_v34 = vld [vmem:[#allocation2 + $0xd4] sm:$0xf]  ;;  %v4260_v35 = vld [vmem:[#allocation2 + $0x2c] sm:$0xff]  ;;  %vm1259_vm4 = vcmask 1041409  }
  0x1e   : > { %s472_s23 = scalar_lea.vmem %s5285_s0, %s4795_s16  ;;  %v659_v13 = vsel %vm611_vm0, %v651_v9, 0  ;;  %v720_v14 = vsel %vm611_vm0, %v711_v10, 0  ;;  %618 = vmatpush.bf16.msra.mxu0 %v613_v12  ;;  %v784_v15 = vsel %vm611_vm0, %v775_v11, 0  ;;  %v1010_v30 = vld [vmem:[#allocation2 + $0x11c] sm:$0xf]  ;;  %v4256_v36 = vld [vmem:[#allocation2 + $0x8] sm:$0xff]  ;;  %v905_v43 = vunpack.c.l.b16 %v884_v34  ;;  %s4814_s26 = scalar_lea.vmem %s5286_s1, %s4795_s16 }
  0x1f   : > { %664 = vmatpush.bf16.msra.mxu1 %v659_v13  ;;  %725 = vmatpush.bf16.msra.mxu2 %v720_v14  ;;  %v4805_v20 = vld [vmem:[%s472_s23] sm:$0xff]  ;;  %v509_v21 = vld [vmem:[%s472_s23 + $0x8] sm:$0x1]  ;;  %v1042_v37 = vunpack.c.l.b16 %v1010_v30  ;;  %v4264_v41 = vld [vmem:[#allocation2 + $0x50] sm:$0xff]  ;;  %v848_v44 = vpack.c.b16 %v843_v32, %v843_v32  ;;  %v974_v45 = vpack.c.b16 %v969_v33, %v969_v33  ;;  %vm1262_vm5 = vcmask 1042434   ;;  %s4244_s25 = sadd.s32 36, %s4795_s16 }
  0x20   : > { %789 = vmatpush.bf16.msra.mxu3 %v784_v15  ;;  %v564_v23 = vunpack.c.l.b16 %v509_v21  ;;  %v571_v27 = vshll.u32 %v4805_v20, 16  ;;  %v569_v38 = vshrl.u32 %v4805_v20, 16  ;;  %v4268_v42 = vld [vmem:[#allocation2 + $0x74] sm:$0xff]  ;;  %v4259_v46 = vld [vmem:[#allocation2 + $0x24] sm:$0xff]  ;;  %v4267_v52 = vld [vmem:[#allocation2 + $0x6c] sm:$0xff]  ;;  %v686_v53 = vrot.slane %v4805_v20, 1  ;;  %s500_s28 = scalar_lea.vmem %s5287_s2, %s4244_s25 }
  0x21   : > { %v4255_v47 = vld [vmem:[#allocation2] sm:$0xff]  ;;  %v1047_v48 = vpack.c.b16 %v1042_v37, %v1042_v37  ;;  %v4263_v51 = vld [vmem:[#allocation2 + $0x48] sm:$0xff]  ;;  %v910_v55 = vpack.c.b16 %v905_v43, %v905_v43  ;;  %v857_v56 = vsel %vm611_vm0, %v848_v44, 0  ;;  %v983_v57 = vsel %vm611_vm0, %v974_v45, 0  ;;  %v3540_v61 = vld [vmem:[%s4814_s26 + $0x14] sm:$0x1] }
  0x22   : > { %619 = vmatpush.bf16.msra.mxu0 %v4262_v16  ;;  %v566_v31 = vpack.c.b16 %v564_v23, %v564_v23  ;;  %v573_v39 = vrot.slane %v571_v27, 1  ;;  %v512_v58 = vld [vmem:[%s4814_s26 + $0x8] sm:$0x1]  ;;  %v4824_v63 = vld [vmem:[%s4814_s26] sm:$0xff]  ;;  %v4282_v2 = vld [vmem:[#allocation2 + $0xf0] sm:$0xff]  ;;  %v1012_v6 = vunpack.c.l.b16 %v3540_v61  ;;  %vm1265_vm6 = vcmask 1043459  }
  0x23   : > { %665 = vmatpush.bf16.msra.mxu1 %v4258_v17  ;;  %726 = vmatpush.bf16.msra.mxu2 %v4266_v18  ;;  %v1056_v59 = vsel %vm611_vm0, %v1047_v48, 0  ;;  %v919_v0 = vsel %vm611_vm0, %v910_v55, 0  ;;  %v4274_v1 = vld [vmem:[#allocation2 + $0xa8] sm:$0xff]  ;;  %v813_v3 = vunpack.c.l.b16 %v512_v58  ;;  %v4286_v4 = vld [vmem:[#allocation2 + $0x114] sm:$0xff]  ;;  %v1083_v8 = vld [vmem:[#allocation2 + $0x140] sm:$0xf] }
  0x24   : > { %790 = vmatpush.bf16.msra.mxu3 %v4270_v19  ;;  %v576_v40 = vshll.u32 %v566_v31, 16  ;;  %v574_v49 = vor.u32 %v573_v39, %v569_v38  ;;  %v687_v54 = vrot.slane %v566_v31, 1  ;;  %v4829_v5 = vld [vmem:[%s4814_s26 + $0xc] sm:$0xff]  ;;  %v4273_v9 = vld [vmem:[#allocation2 + $0xa0] sm:$0xff]  ;;  %v817_v12 = vshll.u32 %v4824_v63, 16  ;;  %v4272_v18 = vld [vmem:[#allocation2 + $0x98] sm:$0xff] }
  0x25   : > { %v4278_v7 = vld [vmem:[#allocation2 + $0xcc] sm:$0xff]  ;;  %v814_v11 = vpack.c.b16 %v813_v3, %v813_v3  ;;  %v1013_v14 = vpack.c.b16 %v1012_v6, %v1012_v6  ;;  %v1016_v15 = vshll.u32 %v4829_v5, 16  ;;  %v1104_v16 = vunpack.c.l.b16 %v1083_v8  ;;  %v4277_v17 = vld [vmem:[#allocation2 + $0xc4] sm:$0xff]  ;;  %v4279_v30 = vld [vmem:[#allocation2 + $0xd8] sm:$0xff]  ;;  %s4399_s24 = sshll.u32 %s4669_s12, 5 }
  0x26   : > { %620 = vmatpush.bf16.msra.mxu0 %v4261_v22  ;;  %v578_v50 = vrot.slane %v576_v40, 1  ;;  %v688_v62 = vsel %vm685_vm2, %v686_v53, %v687_v54  ;;  %v4281_v10 = vld [vmem:[#allocation2 + $0xe8] sm:$0xff]  ;;  %v4280_v19 = vld [vmem:[#allocation2 + $0xe0] sm:$0xff]  ;;  %v819_v21 = vrot.slane %v817_v12, 1  ;;  %v4275_v37 = vld [vmem:[#allocation2 + $0xb4] sm:$0xff]  ;;  %v885_v38 = vrot.slane %v4824_v63, 1  ;;  %s3387_s27 = scalar_lea.hbm %s5294_s9, %s4399_s24 }
  0x27   : > { %666 = vmatpush.bf16.msra.mxu1 %v4257_v24  ;;  %727 = vmatpush.bf16.msra.mxu2 %v4265_v28  ;;  %v4285_v13 = vld [vmem:[#allocation2 + $0x10c] sm:$0xff]  ;;  %v822_v22 = vshll.u32 %v814_v11, 16  ;;  %v4284_v23 = vld [vmem:[#allocation2 + $0x104] sm:$0xff]  ;;  %v1014_v24 = vshrl.u32 %v4829_v5, 16  ;;  %v1018_v25 = vrot.slane %v1016_v15, 1  ;;  %v1021_v26 = vshll.u32 %v1013_v14, 16 }
  0x28   : > { %791 = vmatpush.bf16.msra.mxu3 %v4269_v29  ;;  %v579_v60 = vsel %vm567_vm1, %v574_v49, %v578_v50  ;;  %v1109_v27 = vpack.c.b16 %v1104_v16, %v1104_v16  ;;  %v4276_v28 = vld [vmem:[#allocation2 + $0xbc] sm:$0xff]  ;;  %v4271_v29 = vld [vmem:[#allocation2 + $0x90] sm:$0xff]  ;;  %v886_v39 = vrot.slane %v814_v11, 1  ;;  %v4288_v45 = vld [vmem:[#allocation2 + $0x128] sm:$0xff]  ;;  %v1085_v48 = vrot.slane %v1013_v14, 1  ;;  %s3390_s29 = sshll.u32 %s3387_s27, 4  ;;  %s3391_s29 = int_to_ptr.hbm [resolvable:$true] %s3390_s29 }
  0x29   : > { %v824_v32 = vrot.slane %v822_v22, 1  ;;  %v4283_v33 = vld [vmem:[#allocation2 + $0xfc] sm:$0xff]  ;;  %v1019_v34 = vor.u32 %v1018_v25, %v1014_v24  ;;  %v4289_v44 = vld [vmem:[#allocation2 + $0x130] sm:$0xff]  ;;  %vm1268_vm7 = vcmask 1044484   ;;  %vm1271_vm8 = vcmask 1045509   ;;  %s4615_s24 = scalar_lea.hbm %s5294_s9, 64 }
  0x2a   : > { %621 = vmatpush.bf16.msra.mxu0 %v4260_v35  ;;  %v1023_v35 = vrot.slane %v1021_v26, 1  ;;  %v4851_v43 = vsel %vm685_vm2, %v885_v38, %v886_v39  ;;  %vm1274_vm9 = vcmask 1046534   ;;  %vm1277_vm10 = vcmask 1047559  }
  0x2b   : > { %667 = vmatpush.bf16.msra.mxu1 %v4256_v36  ;;  %728 = vmatpush.bf16.msra.mxu2 %v4264_v41  ;;  %v1118_v36 = vsel %vm611_vm0, %v1109_v27, 0  ;;  %vm1304_vm11 = vcmask 523264  }
  0x2c   : > { %792 = vmatpush.bf16.msra.mxu3 %v4268_v42  ;;  %v4846_v41 = vsel %vm567_vm1, %v1019_v34, %v1023_v35  ;;  %v4290_v42 = vld [vmem:[#allocation2 + $0x138] sm:$0xff] }
  0x2e   : > { %622 = vmatpush.bf16.msra.mxu0 %v4259_v46  ;;  %v4287_v46 = vld [vmem:[#allocation2 + $0x120] sm:$0xff] }
  0x2f   : > { %668 = vmatpush.bf16.msra.mxu1 %v4255_v47  ;;  %729 = vmatpush.bf16.msra.mxu2 %v4263_v51  ;;  %v1084_v47 = vrot.slane %v4829_v5, 1 }
  0x30   : > { %793 = vmatpush.bf16.msra.mxu3 %v4267_v52 }
  0x31   : > { %3567 = vmatmul.msk.bf16.vlgmr.msra.gmra.mxu0 %vm607_vm3, %v579_v60  ;;  %v4861_v49 = vsel %vm685_vm2, %v1084_v47, %v1085_v48 }
  0x32   : > { %862 = vmatpush.bf16.msrb.mxu0 %v857_v56  ;;  %3584 = vmatmul.msk.bf16.vlgmr.msra.gmra.mxu1 %vm607_vm3, %v4805_v20  ;;  %v815_v20 = vshrl.u32 %v4824_v63, 16 }
  0x33   : > { %988 = vmatpush.bf16.msrb.mxu2 %v983_v57  ;;  %924 = vmatpush.bf16.msrb.mxu1 %v919_v0 }
  0x34   : > { %1061 = vmatpush.bf16.msrb.mxu3 %v1056_v59  ;;  %3601 = vmatmul.msk.bf16.vlgmr.msra.gmra.mxu2 %vm607_vm3, %v688_v62  ;;  %v820_v31 = vor.u32 %v819_v21, %v815_v20 }
  0x35   : > { %3622 = vmatmul.msk.bf16.vlgmr.msra.gmra.mxu3 %vm607_vm3, %v4824_v63 }
  0x36   : > { %863 = vmatpush.bf16.msrb.mxu0 %v4274_v1  ;;  %v4843_v40 = vsel %vm567_vm1, %v820_v31, %v824_v32 }
  0x37   : > { %989 = vmatpush.bf16.msrb.mxu2 %v4282_v2  ;;  %925 = vmatpush.bf16.msrb.mxu1 %v4278_v7 }
  0x38   : > { %1062 = vmatpush.bf16.msrb.mxu3 %v4286_v4 }
  0x3a   : > { %864 = vmatpush.bf16.msrb.mxu0 %v4273_v9 }
  0x3b   : > { %990 = vmatpush.bf16.msrb.mxu2 %v4281_v10  ;;  %926 = vmatpush.bf16.msrb.mxu1 %v4277_v17 }
  0x3c   : > { %1063 = vmatpush.bf16.msrb.mxu3 %v4285_v13  ;;  %v4868_v13 = vld [vmem:[%s5289_s4] ss:$0 sm:$0xff] }
  0x3e   : > { %865 = vmatpush.bf16.msrb.mxu0 %v4272_v18  ;;  %v4873_v18 = vld [vmem:[%s5290_s5] ss:$0 sm:$0xff] }
  0x3f   : > { %991 = vmatpush.bf16.msrb.mxu2 %v4280_v19  ;;  %927 = vmatpush.bf16.msrb.mxu1 %v4276_v28  ;;  %v1353_v19 = vld [vmem:[#allocation2 + $0x44] sm:$0xf] }
  0x40   : > { %1064 = vmatpush.bf16.msrb.mxu3 %v4284_v23  ;;  %v1371_v20 = vunpack.c.l.b16 %v1353_v19  ;;  %v1505_v19 = vld [vmem:[#allocation2 + $0x8c] sm:$0xf] }
  0x42   : > { %866 = vmatpush.bf16.msrb.mxu0 %v4271_v29  ;;  %v1376_v24 = vpack.c.b16 %v1371_v20, %v1371_v20 }
  0x43   : > { %992 = vmatpush.bf16.msrb.mxu2 %v4279_v30  ;;  %928 = vmatpush.bf16.msrb.mxu1 %v4275_v37 }
  0x44   : > { %1065 = vmatpush.bf16.msrb.mxu3 %v4283_v33  ;;  %v1382_v26 = vsel %vm611_vm0, %v1376_v24, 0 }
  0x45   : > { %3639 = vmatmul.msk.bf16.vlgmr.msrb.gmra.mxu0 %vm607_vm3, %v4843_v40 }
  0x46   : > { %1123 = vmatpush.bf16.msra.mxu0 %v1118_v36  ;;  %3677 = vmatmul.msk.bf16.vlgmr.msrb.gmra.mxu2 %vm607_vm3, %v4829_v5 }
  0x47   : > { %3694 = vmatmul.msk.bf16.vlgmr.msrb.gmra.mxu3 %vm607_vm3, %v4846_v41  ;;  %3656 = vmatmul.msk.bf16.vlgmr.msrb.gmra.mxu1 %vm607_vm3, %v4851_v43 }
  0x48   : > { %1387 = vmatpush.bf16.msra.mxu2 %v1382_v26 }
  0x4a   : > { %1124 = vmatpush.bf16.msra.mxu0 %v4290_v42 }
  0x4e   : > { %1125 = vmatpush.bf16.msra.mxu0 %v4289_v44 }
  0x52   : > { %1126 = vmatpush.bf16.msra.mxu0 %v4288_v45 }
  0x56   : > { %1127 = vmatpush.bf16.msra.mxu0 %v4287_v46 }
  0x59   : > { %3711 = vmatmul.msk.bf16.vlgmr.msra.gmra.mxu0 %vm607_vm3, %v4861_v49 }
  0xae   : > { %v624_v50 = vpop.f32.mrf.mxu0 }
  0xaf   : > { %v670_v51 = vpop.f32.mrf.mxu1 }
  0xb0   : > { %v671_v57 = vadd.f32 %v670_v51, %v624_v50 }
  0xb6   : > { %v626_v53 = vpop.f32.mrf.mxu0 }
  0xb7   : > { %v731_v52 = vpop.f32.mrf.mxu2  ;;  %v672_v55 = vpop.f32.mrf.mxu1 }
  0xb8   : > { %v795_v54 = vpop.f32.mrf.mxu3  ;;  %v736_v58 = vadd.f32 %v731_v52, %v671_v57  ;;  %v673_v0 = vadd.f32 %v672_v55, %v626_v53 }
  0xba   : > { %v800_v61 = vadd.f32 %v795_v54, %v736_v58 }
  0xbf   : > { %v733_v56 = vpop.f32.mrf.mxu2 }
  0xc0   : > { %v797_v60 = vpop.f32.mrf.mxu3  ;;  %v737_v3 = vadd.f32 %v733_v56, %v673_v0 }
  0xc2   : > { %v868_v59 = vpop.f32.mrf.mxu0  ;;  %v801_v8 = vadd.f32 %v797_v60, %v737_v3 }
  0xc3   : > { %v873_v1 = vadd.f32 %v868_v59, %v800_v61 }
  0xc4   : > { %v930_v62 = vpop.f32.mrf.mxu1 }
  0xc5   : > { %v935_v6 = vadd.f32 %v930_v62, %v873_v1  ;;  %v1344_v1 = vld [vmem:[#allocation2 + $0x20] sm:$0xf] }
  0xc9   : > { %v994_v2 = vpop.f32.mrf.mxu2 }
  0xca   : > { %v870_v4 = vpop.f32.mrf.mxu0  ;;  %v1067_v7 = vpop.f32.mrf.mxu3  ;;  %v999_v9 = vadd.f32 %v994_v2, %v935_v6  ;;  %v1415_v2 = vunpack.c.l.b16 %v1344_v1  ;;  %v4298_v6 = vld [vmem:[#allocation2 + $0x3c] sm:$0xff] }
  0xcb   : > { %v874_v10 = vadd.f32 %v870_v4, %v801_v8  ;;  %1388 = vmatpush.bf16.msra.mxu2 %v4298_v6  ;;  %v4297_v8 = vld [vmem:[#allocation2 + $0x34] sm:$0xff] }
  0xcc   : > { %v932_v11 = vpop.f32.mrf.mxu1  ;;  %v1072_v12 = vadd.f32 %v1067_v7, %v999_v9  ;;  %v1420_v3 = vpack.c.b16 %v1415_v2, %v1415_v2  ;;  %v4294_v7 = vld [vmem:[#allocation2 + $0x18] sm:$0xff]  ;;  %v4293_v9 = vld [vmem:[#allocation2 + $0x10] sm:$0xff] }
  0xcd   : > { %v936_v16 = vadd.f32 %v932_v11, %v874_v10  ;;  %v4296_v10 = vld [vmem:[#allocation2 + $0x2c] sm:$0xff] }
  0xce   : > { %v1426_v4 = vsel %vm611_vm0, %v1420_v3, 0  ;;  %v1560_v11 = vld [vmem:[#allocation2 + $0xb0] sm:$0xf] }
  0xcf   : > { %1431 = vmatpush.bf16.msra.mxu3 %v1426_v4  ;;  %1389 = vmatpush.bf16.msra.mxu2 %v4297_v8  ;;  %v4303_v2 = vld [vmem:[#allocation2 + $0x6c] sm:$0xff]  ;;  %v4326_v8 = vld [vmem:[#allocation2 + $0x138] sm:$0xff] }
  0xd1   : > { %v996_v14 = vpop.f32.mrf.mxu2 }
  0xd2   : > { %v1000_v21 = vadd.f32 %v996_v14, %v936_v16  ;;  %v1069_v23 = vpop.f32.mrf.mxu3  ;;  %v4292_v14 = vld [vmem:[#allocation2 + $0x8] sm:$0xff] }
  0xd3   : > { %1432 = vmatpush.bf16.msra.mxu3 %v4294_v7  ;;  %1390 = vmatpush.bf16.msra.mxu2 %v4296_v10  ;;  %v4295_v16 = vld [vmem:[#allocation2 + $0x24] sm:$0xff]  ;;  %v4312_v10 = vld [vmem:[#allocation2 + $0xbc] sm:$0xff] }
  0xd4   : > { %v1073_v27 = vadd.f32 %v1069_v23, %v1000_v21  ;;  %v4919_v21 = vld [vmem:[%s5291_s6 + $0x10] sm:$0xff]  ;;  %v1523_v23 = vunpack.c.l.b16 %v1505_v19  ;;  %v4299_v19 = vld [vmem:[#allocation2 + $0x48] sm:$0xff] }
  0xd6   : > { %v1129_v15 = vpop.f32.mrf.mxu0  ;;  %v1528_v24 = vpack.c.b16 %v1523_v23, %v1523_v23  ;;  %v4311_v23 = vld [vmem:[#allocation2 + $0xb4] sm:$0xff] }
  0xd7   : > { %v1134_v17 = vadd.f32 %v1129_v15, %v1072_v12  ;;  %1433 = vmatpush.bf16.msra.mxu3 %v4293_v9  ;;  %v4912_v12 = vld [vmem:[%s5291_s6 + $0x18] sm:$0xff]  ;;  %v1578_v15 = vunpack.c.l.b16 %v1560_v11  ;;  %1391 = vmatpush.bf16.msra.mxu2 %v4295_v16  ;;  %v4300_v9 = vld [vmem:[#allocation2 + $0x50] sm:$0xff] }
  0xd8   : > { %1312 = vmatpush.bf16.msra.mxu1 %v4912_v12  ;;  %v1534_v26 = vsel %vm611_vm0, %v1528_v24, 0 }
  0xd9   : > { %v1139_v22 = vmul.f32 %v4868_v13, %v1134_v17  ;;  %v1583_v17 = vpack.c.b16 %v1578_v15, %v1578_v15  ;;  %1539 = vmatpush.bf16.msrb.mxu0 %v1534_v26  ;;  %v4322_v15 = vld [vmem:[#allocation2 + $0x114] sm:$0xff] }
  0xda   : > { %3753 = vmatmul.msk.bf16.vlgmr.msra.gmra.mxu2 %vm607_vm3, %v4843_v40  ;;  %v4309_v40 = vld [vmem:[#allocation2 + $0xa0] sm:$0xff] }
  0xdb   : > { %v1144_v25 = vadd.f32 %v4873_v18, %v1139_v22  ;;  %1434 = vmatpush.bf16.msra.mxu3 %v4292_v14  ;;  %v1589_v20 = vsel %vm611_vm0, %v1583_v17, 0  ;;  %v4291_v22 = vld [vmem:[#allocation2] sm:$0xff] }
  0xdc   : > { %1594 = vmatpush.bf16.msrb.mxu2 %v1589_v20  ;;  %1313 = vmatpush.bf16.msra.mxu1 %v4919_v21 }
  0xdd   : > { %v1146_v28 = vmax.f32 %v1144_v25, 0.0  ;;  %v4310_v25 = vld [vmem:[#allocation2 + $0xa8] sm:$0xff] }
  0xde   : > { %v1131_v29 = vpop.f32.mrf.mxu0 }
  0xdf   : > { %v1135_v30 = vadd.f32 %v1131_v29, %v1073_v27  ;;  %v1150_v31 = vrot.slane %v1146_v28, 2  ;;  %v1151_v32 = vrot.slane %v1146_v28, 4  ;;  %v1152_v36 = vrot.slane %v1146_v28, 6  ;;  %1435 = vmatpush.bf16.msra.mxu3 %v4291_v22  ;;  %v4928_v27 = vld [vmem:[%s5291_s6 + $0x8] sm:$0xff] }
  0xe0   : > { %v3712_v46 = vrot.slane %v1146_v28, 9  ;;  %1595 = vmatpush.bf16.msrb.mxu2 %v4310_v25  ;;  %1314 = vmatpush.bf16.msra.mxu1 %v4928_v27 }
  0xe1   : > { %v1140_v33 = vmul.f32 %v4868_v13, %v1135_v30  ;;  %v3713_v34 = vrot.slane %v1150_v31, 9  ;;  %v3714_v35 = vrot.slane %v1151_v32, 9  ;;  %v3715_v45 = vrot.slane %v1152_v36, 9  ;;  %v1615_v30 = vld [vmem:[#allocation2 + $0xd4] sm:$0xf] }
  0xe2   : > { %v4889_v54 = vmax.f32 %v1146_v28, %v3712_v46  ;;  %3770 = vmatmul.msk.bf16.vlgmr.msra.gmra.mxu3 %vm607_vm3, %v4824_v63  ;;  %v1450_v28 = vld [vmem:[#allocation2 + $0x68] sm:$0xf] }
  0xe3   : > { %v1145_v37 = vadd.f32 %v4873_v18, %v1140_v33  ;;  %v4880_v38 = vmax.f32 %v1150_v31, %v3713_v34  ;;  %v4882_v39 = vmax.f32 %v1151_v32, %v3714_v35  ;;  %v4887_v50 = vmax.f32 %v1152_v36, %v3715_v45  ;;  %v4306_v31 = vld [vmem:[#allocation2 + $0x84] sm:$0xff] }
  0xe4   : > { %v1468_v29 = vunpack.c.l.b16 %v1450_v28  ;;  %v1633_v32 = vunpack.c.l.b16 %v1615_v30  ;;  %v4936_v33 = vld [vmem:[%s5291_s6] sm:$0xff]  ;;  %1540 = vmatpush.bf16.msrb.mxu0 %v4306_v31  ;;  %1596 = vmatpush.bf16.msrb.mxu2 %v4309_v40  ;;  %v4321_v30 = vld [vmem:[#allocation2 + $0x10c] sm:$0xff] }
  0xe5   : > { %v1147_v42 = vmax.f32 %v1145_v37, 0.0  ;;  %v4474_v44 = vpack.i.bf16 %v4882_v39, %v4880_v38  ;;  %v4479_v57 = vpack.i.bf16 %v4887_v50, %v4889_v54  ;;  %1315 = vmatpush.bf16.msra.mxu1 %v4936_v33  ;;  %v4305_v37 = vld [vmem:[#allocation2 + $0x7c] sm:$0xff] }
  0xe6   : > { %v1473_v34 = vpack.c.b16 %v1468_v29, %v1468_v29  ;;  %v1638_v35 = vpack.c.b16 %v1633_v32, %v1633_v32  ;;  %v4302_v45 = vld [vmem:[#allocation2 + $0x60] sm:$0xff] }
  0xe7   : > { %4475 = vrot.lane.b32.xlu0 %v4474_v44, %s4682_s18  ;;  %v1153_v47 = vrot.slane %v1147_v42, 2  ;;  %v3716_v48 = vrot.slane %v1147_v42, 9  ;;  %v1154_v52 = vrot.slane %v1147_v42, 4  ;;  %v1155_v53 = vrot.slane %v1147_v42, 6  ;;  %v1805_v44 = vld [vmem:[#allocation2 + $0x140] sm:$0xf] }
  0xe8   : > { %v1479_v63 = vsel %vm611_vm0, %v1473_v34, 0  ;;  %v1644_v36 = vsel %vm611_vm0, %v1638_v35, 0  ;;  %1541 = vmatpush.bf16.msrb.mxu0 %v4305_v37  ;;  %v1826_v46 = vunpack.c.l.b16 %v1805_v44  ;;  %v4324_v34 = vld [vmem:[#allocation2 + $0x128] sm:$0xff] }
  0xe9   : > { %v3717_v51 = vrot.slane %v1153_v47, 9  ;;  %v4891_v55 = vmax.f32 %v1147_v42, %v3716_v48  ;;  %v3718_v59 = vrot.slane %v1154_v52, 9  ;;  %v3719_v60 = vrot.slane %v1155_v53, 9  ;;  %1484 = vmatpush.bf16.msrb.mxu1 %v1479_v63  ;;  %v4308_v42 = vld [vmem:[#allocation2 + $0x98] sm:$0xff]  ;;  %1649 = vmatpush.bf16.msrb.mxu3 %v1644_v36 }
  0xea   : > { %1597 = vmatpush.bf16.msrb.mxu2 %v4308_v42  ;;  %v4304_v48 = vld [vmem:[#allocation2 + $0x74] sm:$0xff] }
  0xeb   : > { %v4893_v56 = vmax.f32 %v1153_v47, %v3717_v51  ;;  %v4901_v61 = vmax.f32 %v1154_v52, %v3718_v59  ;;  %v4903_v62 = vmax.f32 %v1155_v53, %v3719_v60  ;;  %v4314_v47 = vld [vmem:[#allocation2 + $0xcc] sm:$0xff]  ;;  %v1831_v53 = vpack.c.b16 %v1826_v46, %v1826_v46  ;;  %v4313_v60 = vld [vmem:[#allocation2 + $0xc4] sm:$0xff] }
  0xec   : > { %v4307_v51 = vld [vmem:[#allocation2 + $0x90] sm:$0xff]  ;;  %1542 = vmatpush.bf16.msrb.mxu0 %v4304_v48  ;;  %v4958_v48 = vld [vmem:[%s4814_s26 + $0x18] sm:$0xff] }
  0xed   : > { %v4484_v58 = vpack.i.bf16 %v4893_v56, %v4891_v55  ;;  %v4489_v0 = vpack.i.bf16 %v4903_v62, %v4901_v61  ;;  %1485 = vmatpush.bf16.msrb.mxu1 %v4302_v45  ;;  %1650 = vmatpush.bf16.msrb.mxu3 %v4314_v47  ;;  %v1840_v1 = vsel %vm611_vm0, %v1831_v53, 0  ;;  %v4323_v47 = vld [vmem:[#allocation2 + $0x120] sm:$0xff] }
  0xee   : > { %1598 = vmatpush.bf16.msrb.mxu2 %v4307_v51 }
  0xef   : > { %4480 = vrot.lane.b32.xlu0 %v4479_v57, %s4682_s18  ;;  %4485 = vrot.lane.b32.xlu1 %v4484_v58, %s4682_s18  ;;  %v4301_v57 = vld [vmem:[#allocation2 + $0x58] sm:$0xff] }
  0xf0   : > { %1543 = vmatpush.bf16.msrb.mxu0 %v4303_v2 }
  0xf1   : > { %1486 = vmatpush.bf16.msrb.mxu1 %v4301_v57  ;;  %1651 = vmatpush.bf16.msrb.mxu3 %v4313_v60  ;;  %v1670_v60 = vld [vmem:[#allocation2 + $0xf8] sm:$0xf] }
  0xf2   : > { %1845 = vmatpush.bf16.msra.mxu2 %v1840_v1 }
  0xf3   : > { %3821 = vmatmul.msk.bf16.vlgmr.msrb.gmra.mxu2 %vm607_vm3, %v4846_v41  ;;  %3804 = vmatmul.msk.bf16.vlgmr.msrb.gmra.mxu0 %vm607_vm3, %v4829_v5 }
  0xf5   : > { %1487 = vmatpush.bf16.msrb.mxu1 %v4300_v9  ;;  %1652 = vmatpush.bf16.msrb.mxu3 %v4312_v10  ;;  %v1737_v9 = vshrl.u32 %v4958_v48, 16  ;;  %v1739_v10 = vshll.u32 %v4958_v48, 16 }
  0xf6   : > { %1846 = vmatpush.bf16.msra.mxu2 %v4326_v8 }
  0xf7   : > { %4490 = vrot.lane.b32.xlu1 %v4489_v0, %s4682_s18  ;;  %v1733_v0 = vld [vmem:[#allocation2 + $0x11c] sm:$0xf] }
  0xf8   : > { %v1765_v3 = vunpack.c.l.b16 %v1733_v0 }
  0xf9   : > { %1488 = vmatpush.bf16.msrb.mxu1 %v4299_v19  ;;  %1653 = vmatpush.bf16.msrb.mxu3 %v4311_v23 }
  0xfa   : > { %v1770_v7 = vpack.c.b16 %v1765_v3, %v1765_v3 }
  0xfc   : > { %v1779_v11 = vsel %vm611_vm0, %v1770_v7, 0  ;;  %3838 = vmatmul.msk.bf16.vlgmr.msrb.gmra.mxu3 %vm607_vm3, %v4861_v49 }
  0xfd   : > { %1784 = vmatpush.bf16.msra.mxu0 %v1779_v11  ;;  %1996 = vmatpush.bf16.msra.mxu3 %v4912_v12 }
 0x101   : > { %1785 = vmatpush.bf16.msra.mxu0 %v4322_v15  ;;  %1997 = vmatpush.bf16.msra.mxu3 %v4919_v21  ;;  %v1693_v15 = vunpack.c.l.b16 %v1670_v60 }
 0x105   : > { %1786 = vmatpush.bf16.msra.mxu0 %v4321_v30  ;;  %1998 = vmatpush.bf16.msra.mxu3 %v4928_v27 }
 0x109   : > { %1999 = vmatpush.bf16.msra.mxu3 %v4936_v33 }
 0x159   : > { %v4476_v52 = vpop.permute.xlu0 %4475 }
 0x15a   : > { %v4478_v58 = vunpack.i.h.bf16 %v4476_v52  ;;  %v4477_v59 = vunpack.i.l.bf16 %v4476_v52 }
 0x15c   : > { %v1227_v4 = vmax.f32 %v4880_v38, %v4477_v59  ;;  %v1228_v6 = vmax.f32 %v4882_v39, %v4478_v58  ;;  %v4325_v39 = vld [vmem:[#allocation2 + $0x130] sm:$0xff] }
 0x15d   : > { %1847 = vmatpush.bf16.msra.mxu2 %v4325_v39 }
 0x15e   : > { %v1235_v14 = vpack.c.bf16 %v1227_v4, %v1227_v4  ;;  %v1236_v38 = vpack.c.bf16 %v1228_v6, %v1228_v6  ;;  %v1806_v4 = vrot.slane %v4958_v48, 1  ;;  %v4319_v6 = vld [vmem:[#allocation2 + $0xfc] sm:$0xff] }
 0x160   : > { %v1251_v26 = vunpack.c.l.b16 %v1235_v14  ;;  %v1252_v31 = vunpack.c.l.b16 %v1236_v38 }
 0x161   : > { %v4481_v16 = vpop.permute.xlu0 %4480  ;;  %v4486_v17 = vpop.permute.xlu1 %4485  ;;  %1848 = vmatpush.bf16.msra.mxu2 %v4324_v34  ;;  %v4317_v34 = vld [vmem:[#allocation2 + $0xe8] sm:$0xff] }
 0x162   : > { %v4483_v20 = vunpack.i.h.bf16 %v4481_v16  ;;  %v4482_v22 = vunpack.i.l.bf16 %v4481_v16  ;;  %v4488_v24 = vunpack.i.h.bf16 %v4486_v17  ;;  %v4487_v25 = vunpack.i.l.bf16 %v4486_v17 }
 0x163   : > { %v1258_v36 = vrot.slane %v1251_v26, 7  ;;  %v1261_v44 = vrot.slane %v1252_v31, 6 }
 0x164   : > { %v1229_v28 = vmax.f32 %v4887_v50, %v4483_v20  ;;  %v1226_v29 = vmax.f32 %v4889_v54, %v4482_v22  ;;  %v1231_v40 = vmax.f32 %v4893_v56, %v4488_v24  ;;  %v1230_v32 = vmax.f32 %v4891_v55, %v4487_v25  ;;  %v3543_v54 = vld [vmem:[%s4814_s26 + $0x20] sm:$0x1]  ;;  %v4320_v56 = vld [vmem:[#allocation2 + $0x104] sm:$0xff] }
 0x165   : > { %v1735_v55 = vunpack.c.l.b16 %v3543_v54  ;;  %1787 = vmatpush.bf16.msra.mxu0 %v4320_v56  ;;  %1849 = vmatpush.bf16.msra.mxu2 %v4323_v47  ;;  %v1698_v25 = vpack.c.b16 %v1693_v15, %v1693_v15 }
 0x166   : > { %v1237_v5 = vpack.c.bf16 %v1229_v28, %v1229_v28  ;;  %v1234_v35 = vpack.c.bf16 %v1226_v29, %v1226_v29  ;;  %v1239_v63 = vpack.c.bf16 %v1231_v40, %v1231_v40  ;;  %v1238_v50 = vpack.c.bf16 %v1230_v32, %v1230_v32  ;;  %v4318_v32 = vld [vmem:[#allocation2 + $0xf0] sm:$0xff] }
 0x167   : > { %v1736_v0 = vpack.c.b16 %v1735_v55, %v1735_v55  ;;  %v1707_v40 = vsel %vm611_vm0, %v1698_v25, 0 }
 0x168   : > { %v1253_v37 = vunpack.c.l.b16 %v1237_v5  ;;  %v1250_v42 = vunpack.c.l.b16 %v1234_v35  ;;  %v1254_v45 = vunpack.c.l.b16 %v1238_v50  ;;  %v1255_v59 = vunpack.c.l.b16 %v1239_v63  ;;  %v4316_v5 = vld [vmem:[#allocation2 + $0xe0] sm:$0xff]  ;;  %v4315_v35 = vld [vmem:[#allocation2 + $0xd8] sm:$0xff]  ;;  %v1393_v63 = vpop.f32.mrf.mxu2 }
 0x169   : > { %v4491_v46 = vpop.permute.xlu1 %4490  ;;  %v1807_v8 = vrot.slane %v1736_v0, 1  ;;  %v1744_v38 = vshll.u32 %v1736_v0, 16  ;;  %1788 = vmatpush.bf16.msra.mxu0 %v4319_v6 }
 0x16a   : > { %v1264_v51 = vrot.slane %v1253_v37, 5  ;;  %v1260_v52 = vsel %vm1259_vm4, %v1258_v36, %v1250_v42  ;;  %v4493_v53 = vunpack.i.h.bf16 %v4491_v46  ;;  %v4492_v57 = vunpack.i.l.bf16 %v4491_v46  ;;  %v1437_v36 = vpop.f32.mrf.mxu3 }
 0x16b   : > { %v1263_v58 = vsel %vm1262_vm5, %v1261_v44, %v1260_v52  ;;  %v1267_v1 = vrot.slane %v1254_v45, 4  ;;  %v1746_v19 = vrot.slane %v1744_v38, 1  ;;  %v1270_v20 = vrot.slane %v1255_v59, 3 }
 0x16c   : > { %v1233_v2 = vmax.f32 %v4903_v62, %v4493_v53  ;;  %v1232_v3 = vmax.f32 %v4901_v61, %v4492_v57  ;;  %v1266_v7 = vsel %vm1265_vm6, %v1264_v51, %v1263_v58  ;;  %v4970_v62 = vsel %vm685_vm2, %v1806_v4, %v1807_v8 }
 0x16d   : > { %v1741_v61 = vrot.slane %v1739_v10, 1  ;;  %v1269_v16 = vsel %vm1268_vm7, %v1267_v1, %v1266_v7  ;;  %3893 = vmatmul.msk.bf16.vlgmr.msra.gmra.mxu2 %vm607_vm3, %v4970_v62  ;;  %v1438_v44 = vadd.f32 %v1437_v36, %v1393_v63 }
 0x16e   : > { %v1241_v11 = vpack.c.bf16 %v1233_v2, %v1233_v2  ;;  %v1240_v14 = vpack.c.bf16 %v1232_v3, %v1232_v3  ;;  %v1272_v26 = vsel %vm1271_vm8, %v1270_v20, %v1269_v16 }
 0x16f   : > { %v1742_v22 = vor.u32 %v1741_v61, %v1737_v9 }
 0x170   : > { %v1257_v17 = vunpack.c.l.b16 %v1241_v11  ;;  %v1256_v39 = vunpack.c.l.b16 %v1240_v14  ;;  %v1395_v54 = vpop.f32.mrf.mxu2  ;;  %v1545_v42 = vpop.f32.mrf.mxu0 }
 0x171   : > { %v4978_v28 = vsel %vm567_vm1, %v1742_v22, %v1746_v19 }
 0x172   : > { %v1276_v23 = vrot.slane %v1257_v17, 1  ;;  %v1273_v24 = vrot.slane %v1256_v39, 2  ;;  %3876 = vmatmul.msk.bf16.vlgmr.msra.gmra.mxu0 %vm607_vm3, %v4978_v28  ;;  %v1439_v45 = vpop.f32.mrf.mxu3 }
 0x173   : > { %v1440_v53 = vadd.f32 %v1439_v45, %v1395_v54 }
 0x174   : > { %v1275_v29 = vsel %vm1274_vm9, %v1273_v24, %v1272_v26 }
 0x175   : > { %v1278_v30 = vsel %vm1277_vm10, %v1276_v23, %v1275_v29 }
 0x176   : > { %v1279_v31 = vpack.c.b16 %v1278_v30, %v1278_v30 }
 0x178   : > { %3736 = vmatmul.msk.bf16.vlgmr.msra.gmra.mxu1 %vm1304_vm11, %v1279_v31  ;;  %v1600_v56 = vpop.f32.mrf.mxu2  ;;  %v1547_v47 = vpop.f32.mrf.mxu0 }
 0x179   : > { %1712 = vmatpush.bf16.msra.mxu1 %v1707_v40 }
 0x17d   : > { %1713 = vmatpush.bf16.msra.mxu1 %v4318_v32 }
 0x17f   : > { %v1655_v57 = vpop.f32.mrf.mxu3 }
 0x180   : > { %v1602_v52 = vpop.f32.mrf.mxu2 }
 0x181   : > { %1714 = vmatpush.bf16.msra.mxu1 %v4317_v34 }
 0x185   : > { %1715 = vmatpush.bf16.msra.mxu1 %v4316_v5 }
 0x187   : > { %v1657_v8 = vpop.f32.mrf.mxu3 }
 0x188   : > { %3787 = vmatmul.msk.bf16.vlgmr.msrb.gmra.mxu1 %vm607_vm3, %v4851_v43 }
 0x189   : > { %1716 = vmatpush.bf16.msra.mxu1 %v4315_v35 }
 0x198   : > { %3859 = vmatmul.msk.bf16.vlgmr.msra.gmra.mxu1 %vm607_vm3, %v4958_v48 }
 0x1ef   : > { %v1790_v1 = vpop.f32.mrf.mxu0 }
 0x1f0   : > { %v1851_v4 = vpop.f32.mrf.mxu2 }
 0x1f5   : > { %v4991_v50 = vpop.f32.mrf.mxu1 }
 0x1f7   : > { %v1792_v61 = vpop.f32.mrf.mxu0 }
 0x1f8   : > { %v1853_v39 = vpop.f32.mrf.mxu2 }
 0x1fd   : > { %v1319_v37 = vpop.f32.mrf.mxu1 }
 0x205   : > { %v1490_v55 = vpop.f32.mrf.mxu1 }
 0x206   : > { %v1495_v46 = vadd.f32 %v1490_v55, %v1438_v44 }
 0x208   : > { %v1550_v51 = vadd.f32 %v1545_v42, %v1495_v46 }
 0x20a   : > { %v1605_v58 = vadd.f32 %v1600_v56, %v1550_v51 }
 0x20c   : > { %v1660_v60 = vadd.f32 %v1655_v57, %v1605_v58 }
 0x20d   : > { %v1492_v43 = vpop.f32.mrf.mxu1 }
 0x20e   : > { %v1496_v59 = vadd.f32 %v1492_v43, %v1440_v53  ;;  %v2032_v43 = vld [vmem:[#allocation2 + $0x44] sm:$0xf] }
 0x20f   : > { %v2050_v53 = vunpack.c.l.b16 %v2032_v43 }
 0x210   : > { %v1551_v0 = vadd.f32 %v1547_v47, %v1496_v59  ;;  %v4334_v59 = vld [vmem:[#allocation2 + $0x3c] sm:$0xff] }
 0x211   : > { %v2055_v57 = vpack.c.b16 %v2050_v53, %v2050_v53 }
 0x212   : > { %v1606_v6 = vadd.f32 %v1602_v52, %v1551_v0 }
 0x213   : > { %v2061_v58 = vsel %vm611_vm0, %v2055_v57, 0 }
 0x214   : > { %v1661_v10 = vadd.f32 %v1657_v8, %v1606_v6  ;;  %2066 = vmatpush.bf16.msrb.mxu1 %v2061_v58  ;;  %v2129_v6 = vld [vmem:[#allocation2 + $0x68] sm:$0xf] }
 0x215   : > { %v1718_v2 = vpop.f32.mrf.mxu1 }
 0x216   : > { %v1723_v3 = vadd.f32 %v1718_v2, %v1660_v60  ;;  %v2184_v60 = vld [vmem:[#allocation2 + $0x8c] sm:$0xf]  ;;  %v4333_v2 = vld [vmem:[#allocation2 + $0x34] sm:$0xff] }
 0x217   : > { %v2202_v0 = vunpack.c.l.b16 %v2184_v60 }
 0x218   : > { %v1795_v7 = vadd.f32 %v1790_v1, %v1723_v3  ;;  %2067 = vmatpush.bf16.msrb.mxu1 %v4334_v59 }
 0x219   : > { %v2207_v3 = vpack.c.b16 %v2202_v0, %v2202_v0  ;;  %v4344_v0 = vld [vmem:[#allocation2 + $0x98] sm:$0xff] }
 0x21a   : > { %v1856_v9 = vadd.f32 %v1851_v4, %v1795_v7  ;;  %v2023_v4 = vld [vmem:[#allocation2 + $0x20] sm:$0xf] }
 0x21b   : > { %v2213_v7 = vsel %vm611_vm0, %v2207_v3, 0  ;;  %v2094_v8 = vunpack.c.l.b16 %v2023_v4 }
 0x21c   : > { %v1858_v11 = vmul.f32 %v4868_v13, %v1856_v9  ;;  %2068 = vmatpush.bf16.msrb.mxu1 %v4333_v2  ;;  %v2147_v9 = vunpack.c.l.b16 %v2129_v6  ;;  %2218 = vmatpush.bf16.msrb.mxu2 %v2213_v7  ;;  %v4335_v2 = vld [vmem:[#allocation2 + $0x48] sm:$0xff]  ;;  %v2484_v7 = vld [vmem:[#allocation2 + $0x140] sm:$0xf] }
 0x21d   : > { %v1720_v14 = vpop.f32.mrf.mxu1 }
 0x21e   : > { %v1860_v15 = vadd.f32 %v4873_v18, %v1858_v11  ;;  %v1724_v38 = vadd.f32 %v1720_v14, %v1661_v10  ;;  %v4332_v10 = vld [vmem:[#allocation2 + $0x2c] sm:$0xff]  ;;  %v2099_v11 = vpack.c.b16 %v2094_v8, %v2094_v8  ;;  %v2152_v14 = vpack.c.b16 %v2147_v9, %v2147_v9 }
 0x220   : > { %v1862_v16 = vmax.f32 %v1860_v15, 0.0  ;;  %v1796_v17 = vadd.f32 %v1792_v61, %v1724_v38  ;;  %v4342_v15 = vld [vmem:[#allocation2 + $0x84] sm:$0xff]  ;;  %v2239_v38 = vld [vmem:[#allocation2 + $0xb0] sm:$0xf]  ;;  %2069 = vmatpush.bf16.msrb.mxu1 %v4332_v10 }
 0x221   : > { %v2257_v61 = vunpack.c.l.b16 %v2239_v38  ;;  %2219 = vmatpush.bf16.msrb.mxu2 %v4342_v15 }
 0x222   : > { %v1857_v19 = vadd.f32 %v1853_v39, %v1796_v17  ;;  %v1866_v20 = vrot.slane %v1862_v16, 2  ;;  %v1867_v22 = vrot.slane %v1862_v16, 4  ;;  %v1868_v26 = vrot.slane %v1862_v16, 6  ;;  %v4331_v39 = vld [vmem:[#allocation2 + $0x24] sm:$0xff] }
 0x223   : > { %v3894_v5 = vrot.slane %v1862_v16, 9  ;;  %v2158_v17 = vsel %vm611_vm0, %v2152_v14, 0 }
 0x224   : > { %v1859_v23 = vmul.f32 %v4868_v13, %v1857_v19  ;;  %v3895_v24 = vrot.slane %v1866_v20, 9  ;;  %v3896_v25 = vrot.slane %v1867_v22, 9  ;;  %v3897_v34 = vrot.slane %v1868_v26, 9  ;;  %2163 = vmatpush.bf16.msrb.mxu0 %v2158_v17  ;;  %2070 = vmatpush.bf16.msrb.mxu1 %v4331_v39  ;;  %v4354_v39 = vld [vmem:[#allocation2 + $0xf0] sm:$0xff] }
 0x225   : > { %v5006_v56 = vmax.f32 %v1862_v16, %v3894_v5  ;;  %v2105_v16 = vsel %vm611_vm0, %v2099_v11, 0  ;;  %v2262_v19 = vpack.c.b16 %v2257_v61, %v2257_v61  ;;  %v4340_v5 = vld [vmem:[#allocation2 + $0x74] sm:$0xff] }
 0x226   : > { %v1861_v29 = vadd.f32 %v4873_v18, %v1859_v23  ;;  %v4997_v30 = vmax.f32 %v1866_v20, %v3895_v24  ;;  %v4999_v31 = vmax.f32 %v1867_v22, %v3896_v25  ;;  %v5004_v36 = vmax.f32 %v1868_v26, %v3897_v34  ;;  %2110 = vmatpush.bf16.msrb.mxu3 %v2105_v16  ;;  %v4330_v20 = vld [vmem:[#allocation2 + $0x18] sm:$0xff]  ;;  %v4338_v22 = vld [vmem:[#allocation2 + $0x60] sm:$0xff]  ;;  %v4343_v11 = vld [vmem:[#allocation2 + $0x90] sm:$0xff] }
 0x227   : > { %v4341_v23 = vld [vmem:[#allocation2 + $0x7c] sm:$0xff]  ;;  %v2268_v26 = vsel %vm611_vm0, %v2262_v19, 0  ;;  %3920 = vmatmul.msk.bf16.vlgmr.msrb.gmra.mxu1 %vm607_vm3, %v4846_v41  ;;  %v4339_v41 = vld [vmem:[#allocation2 + $0x6c] sm:$0xff] }
 0x228   : > { %v1863_v40 = vmax.f32 %v1861_v29, 0.0  ;;  %v4494_v32 = vpack.i.bf16 %v4999_v31, %v4997_v30  ;;  %v4499_v47 = vpack.i.bf16 %v5004_v36, %v5006_v56  ;;  %2273 = vmatpush.bf16.msra.mxu1 %v2268_v26  ;;  %2164 = vmatpush.bf16.msrb.mxu0 %v4338_v22  ;;  %v4329_v29 = vld [vmem:[#allocation2 + $0x10] sm:$0xff] }
 0x229   : > { %2220 = vmatpush.bf16.msrb.mxu2 %v4341_v23  ;;  %v4357_v19 = vld [vmem:[#allocation2 + $0x10c] sm:$0xff] }
 0x22a   : > { %4495 = vrot.lane.b32.xlu2 %v4494_v32, %s4682_s18  ;;  %v1870_v35 = vrot.slane %v1863_v40, 4  ;;  %v1871_v63 = vrot.slane %v1863_v40, 6  ;;  %v1869_v13 = vrot.slane %v1863_v40, 2  ;;  %v3898_v54 = vrot.slane %v1863_v40, 9  ;;  %2111 = vmatpush.bf16.msrb.mxu3 %v4330_v20  ;;  %v4346_v32 = vld [vmem:[#allocation2 + $0xa8] sm:$0xff] }
 0x22c   : > { %v3900_v37 = vrot.slane %v1870_v35, 9  ;;  %v3901_v18 = vrot.slane %v1871_v63, 9  ;;  %v3899_v42 = vrot.slane %v1869_v13, 9  ;;  %v5012_v45 = vmax.f32 %v1863_v40, %v3898_v54  ;;  %v4337_v40 = vld [vmem:[#allocation2 + $0x58] sm:$0xff]  ;;  %2274 = vmatpush.bf16.msra.mxu1 %v4346_v32 }
 0x22d   : > { %2165 = vmatpush.bf16.msrb.mxu0 %v4337_v40  ;;  %2221 = vmatpush.bf16.msrb.mxu2 %v4340_v5  ;;  %v2294_v5 = vld [vmem:[#allocation2 + $0xd4] sm:$0xf] }
 0x22e   : > { %v5008_v55 = vmax.f32 %v1870_v35, %v3900_v37  ;;  %v5010_v44 = vmax.f32 %v1871_v63, %v3901_v18  ;;  %v5014_v46 = vmax.f32 %v1869_v13, %v3899_v42  ;;  %v2412_v35 = vld [vmem:[#allocation2 + $0x11c] sm:$0xf]  ;;  %v4345_v18 = vld [vmem:[#allocation2 + $0xa0] sm:$0xff]  ;;  %v2349_v42 = vld [vmem:[#allocation2 + $0xf8] sm:$0xf]  ;;  %2112 = vmatpush.bf16.msrb.mxu3 %v4329_v29 }
 0x22f   : > { %v2444_v54 = vunpack.c.l.b16 %v2412_v35  ;;  %v2372_v43 = vunpack.c.l.b16 %v2349_v42  ;;  %v4362_v29 = vld [vmem:[#allocation2 + $0x138] sm:$0xff]  ;;  %v4353_v35 = vld [vmem:[#allocation2 + $0xe8] sm:$0xff] }
 0x230   : > { %v4509_v51 = vpack.i.bf16 %v5010_v44, %v5008_v55  ;;  %v4504_v52 = vpack.i.bf16 %v5014_v46, %v5012_v45  ;;  %2275 = vmatpush.bf16.msra.mxu1 %v4345_v18 }
 0x231   : > { %v2377_v59 = vpack.c.b16 %v2372_v43, %v2372_v43  ;;  %2222 = vmatpush.bf16.msrb.mxu2 %v4339_v41 }
 0x232   : > { %4500 = vrot.lane.b32.xlu2 %v4499_v47, %s4682_s18  ;;  %4510 = vrot.lane.b32.xlu1 %v4509_v51, %s4682_s18  ;;  %v4328_v47 = vld [vmem:[#allocation2 + $0x8] sm:$0xff]  ;;  %v4336_v51 = vld [vmem:[#allocation2 + $0x50] sm:$0xff] }
 0x233   : > { %4505 = vrot.lane.b32.xlu0 %v4504_v52, %s4682_s18  ;;  %v2449_v52 = vpack.c.b16 %v2444_v54, %v2444_v54  ;;  %2113 = vmatpush.bf16.msrb.mxu3 %v4328_v47  ;;  %v2386_v6 = vsel %vm611_vm0, %v2377_v59, 0  ;;  %v2312_v47 = vunpack.c.l.b16 %v2294_v5 }
 0x234   : > { %2166 = vmatpush.bf16.msrb.mxu0 %v4336_v51  ;;  %2276 = vmatpush.bf16.msra.mxu1 %v4344_v0  ;;  %v4361_v51 = vld [vmem:[#allocation2 + $0x130] sm:$0xff] }
 0x235   : > { %v2458_v60 = vsel %vm611_vm0, %v2449_v52, 0  ;;  %3971 = vmatmul.msk.bf16.vlgmr.msrb.gmra.mxu2 %vm607_vm3, %v4958_v48 }
 0x236   : > { %2463 = vmatpush.bf16.msra.mxu2 %v2458_v60  ;;  %v4355_v60 = vld [vmem:[#allocation2 + $0xfc] sm:$0xff] }
 0x238   : > { %2167 = vmatpush.bf16.msrb.mxu0 %v4335_v2  ;;  %2277 = vmatpush.bf16.msra.mxu1 %v4343_v11 }
 0x23b   : > { %3954 = vmatmul.msk.bf16.vlgmr.msrb.gmra.mxu0 %vm607_vm3, %v4861_v49  ;;  %v5049_v49 = vld [vmem:[%s4814_s26 + $0x24] sm:$0xff]  ;;  %3988 = vmatmul.msk.bf16.vlgmr.msra.gmra.mxu1 %vm607_vm3, %v4978_v28 }
 0x23c   : > { %2391 = vmatpush.bf16.msra.mxu0 %v2386_v6  ;;  %v2416_v52 = vshrl.u32 %v5049_v49, 16  ;;  %v2418_v43 = vshll.u32 %v5049_v49, 16  ;;  %v4360_v6 = vld [vmem:[#allocation2 + $0x128] sm:$0xff] }
 0x23e   : > { %v2420_v0 = vrot.slane %v2418_v43, 1 }
 0x240   : > { %2392 = vmatpush.bf16.msra.mxu0 %v4354_v39  ;;  %v2485_v39 = vrot.slane %v5049_v49, 1 }
 0x244   : > { %2393 = vmatpush.bf16.msra.mxu0 %v4353_v35 }
 0x284   : > { %v4496_v1 = vpop.permute.xlu2 %4495 }
 0x285   : > { %v4497_v24 = vunpack.i.l.bf16 %v4496_v1  ;;  %v4498_v63 = vunpack.i.h.bf16 %v4496_v1  ;;  %v4327_v1 = vld [vmem:[#allocation2] sm:$0xff] }
 0x286   : > { %2114 = vmatpush.bf16.msrb.mxu3 %v4327_v1 }
 0x287   : > { %v1943_v13 = vmax.f32 %v4997_v30, %v4497_v24  ;;  %v1944_v57 = vmax.f32 %v4999_v31, %v4498_v63  ;;  %v4358_v31 = vld [vmem:[#allocation2 + $0x114] sm:$0xff] }
 0x288   : > { %2464 = vmatpush.bf16.msra.mxu2 %v4358_v31 }
 0x289   : > { %v1951_v58 = vpack.c.bf16 %v1943_v13, %v1943_v13  ;;  %v1952_v4 = vpack.c.bf16 %v1944_v57, %v1944_v57 }
 0x28b   : > { %v1968_v15 = vunpack.c.l.b16 %v1952_v4 }
 0x28c   : > { %v4501_v25 = vpop.permute.xlu2 %4500  ;;  %2465 = vmatpush.bf16.msra.mxu2 %v4357_v19 }
 0x28d   : > { %v4502_v34 = vunpack.i.l.bf16 %v4501_v25  ;;  %v4503_v37 = vunpack.i.h.bf16 %v4501_v25  ;;  %v1976_v63 = vrot.slane %v1968_v15, 6 }
 0x28f   : > { %v1942_v53 = vmax.f32 %v5006_v56, %v4502_v34  ;;  %v1945_v30 = vmax.f32 %v5004_v36, %v4503_v37  ;;  %v1967_v56 = vunpack.c.l.b16 %v1951_v58  ;;  %v2505_v36 = vunpack.c.l.b16 %v2484_v7  ;;  %v4352_v58 = vld [vmem:[#allocation2 + $0xe0] sm:$0xff] }
 0x290   : > { %2394 = vmatpush.bf16.msra.mxu0 %v4352_v58 }
 0x291   : > { %v1950_v3 = vpack.c.bf16 %v1942_v53, %v1942_v53  ;;  %v1953_v8 = vpack.c.bf16 %v1945_v30, %v1945_v30  ;;  %v2510_v14 = vpack.c.b16 %v2505_v36, %v2505_v36  ;;  %v1974_v38 = vrot.slane %v1967_v56, 7 }
 0x292   : > { %v2421_v56 = vor.u32 %v2420_v0, %v2416_v52 }
 0x293   : > { %v1966_v9 = vunpack.c.l.b16 %v1950_v3  ;;  %v1969_v20 = vunpack.c.l.b16 %v1953_v8  ;;  %v2519_v24 = vsel %vm611_vm0, %v2510_v14, 0  ;;  %v2317_v8 = vpack.c.b16 %v2312_v47, %v2312_v47 }
 0x294   : > { %2524 = vmatpush.bf16.msrb.mxu1 %v2519_v24  ;;  %v4348_v24 = vld [vmem:[#allocation2 + $0xbc] sm:$0xff] }
 0x295   : > { %v1975_v40 = vsel %vm1259_vm4, %v1974_v38, %v1966_v9  ;;  %v1978_v37 = vrot.slane %v1969_v20, 5  ;;  %v4351_v9 = vld [vmem:[#allocation2 + $0xd8] sm:$0xff]  ;;  %v4350_v20 = vld [vmem:[#allocation2 + $0xcc] sm:$0xff] }
 0x296   : > { %2395 = vmatpush.bf16.msra.mxu0 %v4351_v9 }
 0x298   : > { %2525 = vmatpush.bf16.msrb.mxu1 %v4362_v29 }
 0x299   : > { %4026 = vmatmul.msk.bf16.vlgmr.msra.gmra.mxu0 %vm607_vm3, %v5049_v49 }
 0x29c   : > { %2526 = vmatpush.bf16.msrb.mxu1 %v4361_v51 }
 0x2a0   : > { %2527 = vmatpush.bf16.msrb.mxu1 %v4360_v6 }
 0x2a4   : > { %v4511_v10 = vpop.permute.xlu1 %4510  ;;  %v2072_v29 = vpop.f32.mrf.mxu1 }
 0x2a5   : > { %v4513_v61 = vunpack.i.h.bf16 %v4511_v10  ;;  %v4512_v16 = vunpack.i.l.bf16 %v4511_v10  ;;  %v4506_v17 = vpop.permute.xlu0 %4505 }
 0x2a6   : > { %v4508_v22 = vunpack.i.h.bf16 %v4506_v17  ;;  %v4507_v23 = vunpack.i.l.bf16 %v4506_v17  ;;  %v4359_v17 = vld [vmem:[#allocation2 + $0x120] sm:$0xff] }
 0x2a7   : > { %v1949_v25 = vmax.f32 %v5010_v44, %v4513_v61  ;;  %v1948_v26 = vmax.f32 %v5008_v55, %v4512_v16  ;;  %v4356_v55 = vld [vmem:[#allocation2 + $0x104] sm:$0xff]  ;;  %v3546_v44 = vld [vmem:[%s4814_s26 + $0x2c] sm:$0x1]  ;;  %v2323_v16 = vsel %vm611_vm0, %v2317_v8, 0  ;;  %2528 = vmatpush.bf16.msrb.mxu1 %v4359_v17 }
 0x2a8   : > { %v1947_v32 = vmax.f32 %v5014_v46, %v4508_v22  ;;  %v1946_v34 = vmax.f32 %v5012_v45, %v4507_v23  ;;  %v2414_v46 = vunpack.c.l.b16 %v3546_v44  ;;  %v1977_v45 = vsel %vm1262_vm5, %v1976_v63, %v1975_v40  ;;  %2466 = vmatpush.bf16.msra.mxu2 %v4356_v55  ;;  %v4349_v23 = vld [vmem:[#allocation2 + $0xc4] sm:$0xff] }
 0x2a9   : > { %v1957_v13 = vpack.c.bf16 %v1949_v25, %v1949_v25  ;;  %v1956_v54 = vpack.c.bf16 %v1948_v26, %v1948_v26  ;;  %v1979_v4 = vsel %vm1265_vm6, %v1978_v37, %v1977_v45  ;;  %v4347_v25 = vld [vmem:[#allocation2 + $0xb4] sm:$0xff]  ;;  %v4558_v26 = vld [vmem:[%s4814_s26 + $0xc] sm:$0xff]  ;;  %s457_s26 = sand.u32 1, %s4661_s10  }
 0x2aa   : > { %v1955_v18 = vpack.c.bf16 %v1947_v32, %v1947_v32  ;;  %v1954_v42 = vpack.c.bf16 %v1946_v34, %v1946_v34  ;;  %v2415_v59 = vpack.c.b16 %v2414_v46, %v2414_v46  ;;  %s3534_s20 = sshll.u32 %s457_s26, 5  ;;  %s3374_s15 = scalar_lea.sflag [#allocation4], %s457_s26 }
 0x2ab   : > { %v1972_v53 = vunpack.c.l.b16 %v1956_v54  ;;  %v1973_v30 = vunpack.c.l.b16 %v1957_v13  ;;  %s5225_s23 = scalar_lea.vmem [#allocation5], %s3534_s20  ;;  %s4609_s20 = sshra.s32 %s3391_s29, 4  ;;  %s4610_s20 = int_to_ptr.hbm [resolvable:$true] %s4609_s20 }
 0x2ac   : > { %v1971_v41 = vunpack.c.l.b16 %v1955_v18  ;;  %v1970_v57 = vunpack.c.l.b16 %v1954_v42  ;;  %v2423_v3 = vshll.u32 %v2415_v59, 16  ;;  %2467 = vmatpush.bf16.msra.mxu2 %v4355_v60  ;;  %v2486_v19 = vrot.slane %v2415_v59, 1  ;;  %v2074_v32 = vpop.f32.mrf.mxu1  ;;  %p4616_p5 = scmp.lt.s32.totalorder %s4610_s20, %s5294_s9 }
 0x2ad   : > { %v1984_v31 = vrot.slane %v1972_v53, 2  ;;  %v1986_v10 = vrot.slane %v1973_v30, 1  ;;  %v5090_v30 = vld [vmem:[%s5289_s4] ss:$0 sm:$0xff] }
 0x2ae   : > { %v1982_v1 = vrot.slane %v1971_v41, 3  ;;  %v1980_v2 = vrot.slane %v1970_v57, 4  ;;  %v2425_v36 = vrot.slane %v2423_v3, 1  ;;  %v5073_v22 = vsel %vm685_vm2, %v2485_v39, %v2486_v19 }
 0x2af   : > { %4060 = vmatmul.msk.bf16.vlgmr.msrb.gmra.mxu1 %vm607_vm3, %v5073_v22 }
 0x2b0   : > { %v1981_v7 = vsel %vm1268_vm7, %v1980_v2, %v1979_v4  ;;  %v5062_v15 = vsel %vm567_vm1, %v2421_v56, %v2425_v36  ;;  %v5096_v2 = vld [vmem:[%s5290_s5] ss:$0 sm:$0xff] }
 0x2b1   : > { %v1983_v11 = vsel %vm1271_vm8, %v1982_v1, %v1981_v7  ;;  %4043 = vmatmul.msk.bf16.vlgmr.msra.gmra.mxu2 %vm607_vm3, %v5062_v15 }
 0x2b2   : > { %v1985_v14 = vsel %vm1274_vm9, %v1984_v31, %v1983_v11 }
 0x2b3   : > { %v1987_v38 = vsel %vm1277_vm10, %v1986_v10, %v1985_v14 }
 0x2b4   : > { %v1988_v61 = vpack.c.b16 %v1987_v38, %v1987_v38 }
 0x2b6   : > { %3902 = vmatmul.msk.bf16.vlgmr.msra.gmra.mxu3 %vm1304_vm11, %v1988_v61 }
 0x2b7   : > { %2328 = vmatpush.bf16.msra.mxu3 %v2323_v16 }
 0x2b8   : > { %v2169_v5 = vpop.f32.mrf.mxu0  ;;  %v2224_v35 = vpop.f32.mrf.mxu2 }
 0x2b9   : > { %v2279_v63 = vpop.f32.mrf.mxu1 }
 0x2bb   : > { %2329 = vmatpush.bf16.msra.mxu3 %v4350_v20 }
 0x2bf   : > { %2330 = vmatpush.bf16.msra.mxu3 %v4349_v23 }
 0x2c3   : > { %2331 = vmatpush.bf16.msra.mxu3 %v4348_v24 }
 0x2c6   : > { %3937 = vmatmul.msk.bf16.vlgmr.msrb.gmra.mxu3 %vm607_vm3, %v4558_v26 }
 0x2c7   : > { %2332 = vmatpush.bf16.msra.mxu3 %v4347_v25 }
 0x2cb   : > { %2675 = vmatpush.bf16.msrb.mxu3 %v4912_v12  ;;  %v2171_v12 = vpop.f32.mrf.mxu0 }
 0x2cf   : > { %2676 = vmatpush.bf16.msrb.mxu3 %v4919_v21  ;;  %v2226_v21 = vpop.f32.mrf.mxu2 }
 0x2d3   : > { %2677 = vmatpush.bf16.msrb.mxu3 %v4928_v27  ;;  %v2281_v27 = vpop.f32.mrf.mxu1 }
 0x2d6   : > { %4005 = vmatmul.msk.bf16.vlgmr.msra.gmra.mxu3 %vm607_vm3, %v4970_v62 }
 0x2d7   : > { %2678 = vmatpush.bf16.msrb.mxu3 %v4936_v33 }
 0x316   : > { %v2397_v46 = vpop.f32.mrf.mxu0 }
 0x31e   : > { %v2399_v1 = vpop.f32.mrf.mxu0 }
 0x32c   : > { %v2530_v53 = vpop.f32.mrf.mxu1 }
 0x334   : > { %v2469_v51 = vpop.f32.mrf.mxu2  ;;  %v2532_v7 = vpop.f32.mrf.mxu1 }
 0x339   : > { %v5085_v40 = vpop.f32.mrf.mxu3 }
 0x33c   : > { %v2471_v56 = vpop.f32.mrf.mxu2 }
 0x341   : > { %v2003_v34 = vpop.f32.mrf.mxu3 }
 0x349   : > { %v2116_v13 = vpop.f32.mrf.mxu3 }
 0x34a   : > { %v2117_v54 = vadd.f32 %v2116_v13, %v2072_v29 }
 0x34c   : > { %v2174_v55 = vadd.f32 %v2169_v5, %v2117_v54 }
 0x34e   : > { %v2229_v33 = vadd.f32 %v2224_v35, %v2174_v55 }
 0x350   : > { %v2284_v42 = vadd.f32 %v2279_v63, %v2229_v33 }
 0x351   : > { %v2118_v44 = vpop.f32.mrf.mxu3 }
 0x352   : > { %v2119_v37 = vadd.f32 %v2118_v44, %v2074_v32 }
 0x354   : > { %v2175_v18 = vadd.f32 %v2171_v12, %v2119_v37  ;;  %v2702_v37 = vld [vmem:[#allocation2 + $0x20] sm:$0xf] }
 0x355   : > { %v2773_v33 = vunpack.c.l.b16 %v2702_v37 }
 0x356   : > { %v2230_v43 = vadd.f32 %v2226_v21, %v2175_v18 }
 0x357   : > { %v2778_v18 = vpack.c.b16 %v2773_v33, %v2773_v33 }
 0x358   : > { %v2285_v58 = vadd.f32 %v2281_v27, %v2230_v43  ;;  %v4370_v43 = vld [vmem:[#allocation2 + $0x3c] sm:$0xff] }
 0x359   : > { %v2334_v45 = vpop.f32.mrf.mxu3 }
 0x35a   : > { %v2339_v47 = vadd.f32 %v2334_v45, %v2284_v42  ;;  %v2711_v42 = vld [vmem:[#allocation2 + $0x44] sm:$0xf] }
 0x35b   : > { %v2729_v45 = vunpack.c.l.b16 %v2711_v42  ;;  %v4380_v42 = vld [vmem:[#allocation2 + $0x98] sm:$0xff] }
 0x35c   : > { %v2402_v52 = vadd.f32 %v2397_v46, %v2339_v47  ;;  %v2784_v46 = vsel %vm611_vm0, %v2778_v18, 0 }
 0x35d   : > { %2789 = vmatpush.bf16.msrb.mxu2 %v2784_v46  ;;  %v2734_v47 = vpack.c.b16 %v2729_v45, %v2729_v45 }
 0x35e   : > { %v2474_v41 = vadd.f32 %v2469_v51, %v2402_v52  ;;  %v4366_v51 = vld [vmem:[#allocation2 + $0x18] sm:$0xff] }
 0x35f   : > { %v2740_v52 = vsel %vm611_vm0, %v2734_v47, 0 }
 0x360   : > { %v2535_v57 = vadd.f32 %v2530_v53, %v2474_v41  ;;  %2745 = vmatpush.bf16.msrb.mxu0 %v2740_v52  ;;  %v4365_v53 = vld [vmem:[#allocation2 + $0x10] sm:$0xff] }
 0x361   : > { %v2336_v59 = vpop.f32.mrf.mxu3  ;;  %2790 = vmatpush.bf16.msrb.mxu2 %v4366_v51  ;;  %v4369_v41 = vld [vmem:[#allocation2 + $0x34] sm:$0xff]  ;;  %v4385_v51 = vld [vmem:[#allocation2 + $0xc4] sm:$0xff] }
 0x362   : > { %v2537_v60 = vmul.f32 %v5090_v30, %v2535_v57  ;;  %v2340_v0 = vadd.f32 %v2336_v59, %v2285_v58  ;;  %v4364_v57 = vld [vmem:[#allocation2 + $0x8] sm:$0xff] }
 0x363   : > { %v2808_v58 = vld [vmem:[#allocation2 + $0x68] sm:$0xf]  ;;  %v2863_v59 = vld [vmem:[#allocation2 + $0x8c] sm:$0xf] }
 0x364   : > { %v2539_v3 = vadd.f32 %v5096_v2, %v2537_v60  ;;  %v2403_v4 = vadd.f32 %v2399_v1, %v2340_v0  ;;  %2746 = vmatpush.bf16.msrb.mxu0 %v4370_v43  ;;  %v4368_v60 = vld [vmem:[#allocation2 + $0x2c] sm:$0xff]  ;;  %v4363_v0 = vld [vmem:[#allocation2] sm:$0xff]  ;;  %v2826_v1 = vunpack.c.l.b16 %v2808_v58 }
 0x365   : > { %2791 = vmatpush.bf16.msrb.mxu2 %v4365_v53  ;;  %v4371_v53 = vld [vmem:[#allocation2 + $0x48] sm:$0xff] }
 0x366   : > { %v2541_v6 = vmax.f32 %v2539_v3, 0.0  ;;  %v2475_v31 = vadd.f32 %v2471_v56, %v2403_v4  ;;  %v2881_v3 = vunpack.c.l.b16 %v2863_v59  ;;  %v2918_v4 = vld [vmem:[#allocation2 + $0xb0] sm:$0xf]  ;;  %v2831_v56 = vpack.c.b16 %v2826_v1, %v2826_v1 }
 0x367   : > { %v4375_v59 = vld [vmem:[#allocation2 + $0x6c] sm:$0xff] }
 0x368   : > { %v2536_v8 = vadd.f32 %v2532_v7, %v2475_v31  ;;  %v2547_v36 = vrot.slane %v2541_v6, 6  ;;  %v4061_v9 = vrot.slane %v2541_v6, 9  ;;  %v2545_v10 = vrot.slane %v2541_v6, 2  ;;  %2747 = vmatpush.bf16.msrb.mxu0 %v4369_v41 }
 0x369   : > { %v2546_v11 = vrot.slane %v2541_v6, 4  ;;  %2792 = vmatpush.bf16.msrb.mxu2 %v4364_v57  ;;  %v2936_v31 = vunpack.c.l.b16 %v2918_v4  ;;  %v4384_v4 = vld [vmem:[#allocation2 + $0xbc] sm:$0xff] }
 0x36a   : > { %v2538_v14 = vmul.f32 %v5090_v30, %v2536_v8  ;;  %v4064_v38 = vrot.slane %v2547_v36, 9  ;;  %v4062_v61 = vrot.slane %v2545_v10, 9  ;;  %v5101_v39 = vmax.f32 %v2541_v6, %v4061_v9  ;;  %v4367_v9 = vld [vmem:[#allocation2 + $0x24] sm:$0xff] }
 0x36b   : > { %v4063_v16 = vrot.slane %v2546_v11, 9  ;;  %v2886_v6 = vpack.c.b16 %v2881_v3, %v2881_v3  ;;  %v2837_v8 = vsel %vm611_vm0, %v2831_v56, 0 }
 0x36c   : > { %v2540_v17 = vadd.f32 %v5096_v2, %v2538_v14  ;;  %v5103_v19 = vmax.f32 %v2547_v36, %v4064_v38  ;;  %v5105_v20 = vmax.f32 %v2545_v10, %v4062_v61  ;;  %2748 = vmatpush.bf16.msrb.mxu0 %v4368_v60  ;;  %v2941_v10 = vpack.c.b16 %v2936_v31, %v2936_v31  ;;  %v2973_v14 = vld [vmem:[#allocation2 + $0xd4] sm:$0xf]  ;;  %v4374_v38 = vld [vmem:[#allocation2 + $0x60] sm:$0xff] }
 0x36d   : > { %v5107_v23 = vmax.f32 %v2546_v11, %v4063_v16  ;;  %2793 = vmatpush.bf16.msrb.mxu2 %v4363_v0  ;;  %v2892_v36 = vsel %vm611_vm0, %v2886_v6, 0  ;;  %2842 = vmatpush.bf16.msra.mxu3 %v2837_v8  ;;  %v4378_v61 = vld [vmem:[#allocation2 + $0x84] sm:$0xff]  ;;  %v2991_v16 = vunpack.c.l.b16 %v2973_v14  ;;  %v4379_v0 = vld [vmem:[#allocation2 + $0x90] sm:$0xff] }
 0x36e   : > { %v2542_v24 = vmax.f32 %v2540_v17, 0.0  ;;  %v4519_v25 = vpack.i.bf16 %v5103_v19, %v5101_v39  ;;  %2897 = vmatpush.bf16.msra.mxu1 %v2892_v36  ;;  %v2947_v11 = vsel %vm611_vm0, %v2941_v10, 0  ;;  %v4382_v17 = vld [vmem:[#allocation2 + $0xa8] sm:$0xff]  ;;  %v4383_v14 = vld [vmem:[#allocation2 + $0xb4] sm:$0xff] }
 0x36f   : > { %v4514_v26 = vpack.i.bf16 %v5107_v23, %v5105_v20 }
 0x370   : > { %4520 = vrot.lane.b32.xlu0 %v4519_v25, %s4682_s18  ;;  %v2548_v29 = vrot.slane %v2542_v24, 2  ;;  %v4065_v32 = vrot.slane %v2542_v24, 9  ;;  %v2549_v34 = vrot.slane %v2542_v24, 4  ;;  %v2550_v5 = vrot.slane %v2542_v24, 6  ;;  %4104 = vmatmul.msk.bf16.vlgmr.msrb.gmra.mxu2 %vm607_vm3, %v4958_v48  ;;  %v4377_v48 = vld [vmem:[#allocation2 + $0x7c] sm:$0xff] }
 0x371   : > { %4515 = vrot.lane.b32.xlu2 %v4514_v26, %s4682_s18  ;;  %2749 = vmatpush.bf16.msrb.mxu0 %v4367_v9  ;;  %v2996_v25 = vpack.c.b16 %v2991_v16, %v2991_v16  ;;  %v4373_v26 = vld [vmem:[#allocation2 + $0x58] sm:$0xff] }
 0x372   : > { %v4066_v35 = vrot.slane %v2548_v29, 9  ;;  %v4067_v63 = vrot.slane %v2549_v34, 9  ;;  %v4068_v13 = vrot.slane %v2550_v5, 9  ;;  %v5115_v54 = vmax.f32 %v2542_v24, %v4065_v32  ;;  %2843 = vmatpush.bf16.msra.mxu3 %v4374_v38  ;;  %2898 = vmatpush.bf16.msra.mxu1 %v4378_v61  ;;  %v4381_v32 = vld [vmem:[#allocation2 + $0xa0] sm:$0xff]  ;;  %v4398_v16 = vld [vmem:[#allocation2 + $0x138] sm:$0xff] }
 0x374   : > { %v5117_v12 = vmax.f32 %v2548_v29, %v4066_v35  ;;  %v5119_v55 = vmax.f32 %v2549_v34, %v4067_v63  ;;  %v5121_v21 = vmax.f32 %v2550_v5, %v4068_v13  ;;  %4087 = vmatmul.msk.bf16.vlgmr.msrb.gmra.mxu0 %vm607_vm3, %v4978_v28  ;;  %v3002_v29 = vsel %vm611_vm0, %v2996_v25, 0  ;;  %v4386_v5 = vld [vmem:[#allocation2 + $0xcc] sm:$0xff]  ;;  %v3091_v35 = vld [vmem:[#allocation2 + $0x11c] sm:$0xf]  ;;  %v4376_v28 = vld [vmem:[#allocation2 + $0x74] sm:$0xff] }
 0x375   : > { %2952 = vmatpush.bf16.msra.mxu0 %v2947_v11  ;;  %3007 = vmatpush.bf16.msra.mxu2 %v3002_v29  ;;  %v4372_v13 = vld [vmem:[#allocation2 + $0x50] sm:$0xff] }
 0x376   : > { %v4524_v44 = vpack.i.bf16 %v5117_v12, %v5115_v54  ;;  %v4529_v27 = vpack.i.bf16 %v5121_v21, %v5119_v55  ;;  %2844 = vmatpush.bf16.msra.mxu3 %v4373_v26  ;;  %2899 = vmatpush.bf16.msra.mxu1 %v4377_v48  ;;  %v4394_v11 = vld [vmem:[#allocation2 + $0x114] sm:$0xff]  ;;  %v4393_v48 = vld [vmem:[#allocation2 + $0x10c] sm:$0xff] }
 0x377   : > { %v3028_v26 = vld [vmem:[#allocation2 + $0xf8] sm:$0xf] }
 0x378   : > { %4525 = vrot.lane.b32.xlu1 %v4524_v44, %s4682_s18  ;;  %v3123_v44 = vunpack.c.l.b16 %v3091_v35 }
 0x379   : > { %4530 = vrot.lane.b32.xlu2 %v4529_v27, %s4682_s18  ;;  %2953 = vmatpush.bf16.msra.mxu0 %v4382_v17  ;;  %v3163_v27 = vld [vmem:[#allocation2 + $0x140] sm:$0xf] }
 0x37a   : > { %v3184_v33 = vunpack.c.l.b16 %v3163_v27  ;;  %3008 = vmatpush.bf16.msra.mxu2 %v4386_v5  ;;  %v3128_v52 = vpack.c.b16 %v3123_v44, %v3123_v44  ;;  %2845 = vmatpush.bf16.msra.mxu3 %v4372_v13  ;;  %v3051_v13 = vunpack.c.l.b16 %v3028_v26  ;;  %v4250_v44 = vld [vmem:[%s500_s28] sm:$0xff] }
 0x37b   : > { %2900 = vmatpush.bf16.msra.mxu1 %v4376_v28  ;;  %v527_v28 = vld [vmem:[%s500_s28 + $0x8] sm:$0x1]  ;;  %s3388_s28 = sshll.u32 %s5225_s23, 4  ;;  %s3389_s28 = int_to_ptr.vmem [resolvable:$true] %s3388_s28 }
 0x37c   : > { %v3189_v41 = vpack.c.b16 %v3184_v33, %v3184_v33  ;;  %v3137_v3 = vsel %vm611_vm0, %v3128_v52, 0 }
 0x37d   : > { %2954 = vmatpush.bf16.msra.mxu0 %v4381_v32 }
 0x37e   : > { %3009 = vmatpush.bf16.msra.mxu2 %v4385_v51  ;;  %2846 = vmatpush.bf16.msra.mxu3 %v4371_v53  ;;  %v4562_v51 = vld [vmem:[%s5291_s6 + $0x10] sm:$0xff] }
 0x37f   : > { %2901 = vmatpush.bf16.msra.mxu1 %v4375_v59  ;;  %v4395_v59 = vld [vmem:[#allocation2 + $0x120] sm:$0xff] }
 0x381   : > { %2955 = vmatpush.bf16.msra.mxu0 %v4380_v42  ;;  %v4396_v42 = vld [vmem:[#allocation2 + $0x128] sm:$0xff] }
 0x382   : > { %3010 = vmatpush.bf16.msra.mxu2 %v4384_v4  ;;  %4138 = vmatmul.msk.bf16.vlgmr.msra.gmra.mxu1 %vm607_vm3, %v5049_v49 }
 0x383   : > { %3142 = vmatpush.bf16.msrb.mxu1 %v3137_v3  ;;  %v4563_v3 = vld [vmem:[%s5291_s6 + $0x8] sm:$0xff] }
 0x385   : > { %2956 = vmatpush.bf16.msra.mxu0 %v4379_v0 }
 0x386   : > { %3011 = vmatpush.bf16.msra.mxu2 %v4383_v14  ;;  %v4387_v14 = vld [vmem:[#allocation2 + $0xd8] sm:$0xff] }
 0x387   : > { %3143 = vmatpush.bf16.msrb.mxu1 %v4394_v11  ;;  %v4388_v11 = vld [vmem:[#allocation2 + $0xe0] sm:$0xff] }
 0x388   : > { %4155 = vmatmul.msk.bf16.vlgmr.msra.gmra.mxu0 %vm607_vm3, %v5062_v15  ;;  %v4561_v15 = vld [vmem:[%s5291_s6 + $0x18] sm:$0xff] }
 0x389   : > { %4172 = vmatmul.msk.bf16.vlgmr.msra.gmra.mxu2 %vm607_vm3, %v5073_v22  ;;  %v3097_v22 = vshll.u32 %v4250_v44, 16 }
 0x38a   : > { %3354 = vmatpush.bf16.msrb.mxu2 %v4561_v15 }
 0x38b   : > { %3144 = vmatpush.bf16.msrb.mxu1 %v4393_v48  ;;  %v3099_v0 = vrot.slane %v3097_v22, 1 }
 0x38e   : > { %3355 = vmatpush.bf16.msrb.mxu2 %v4562_v51 }
 0x392   : > { %3356 = vmatpush.bf16.msrb.mxu2 %v4563_v3 }
 0x3cb   : > { %v4516_v7 = vpop.permute.xlu2 %4515 }
 0x3cc   : > { %v4517_v24 = vunpack.i.l.bf16 %v4516_v7  ;;  %v4518_v34 = vunpack.i.h.bf16 %v4516_v7 }
 0x3ce   : > { %v2622_v63 = vmax.f32 %v5105_v20, %v4517_v24  ;;  %v2623_v46 = vmax.f32 %v5107_v23, %v4518_v34 }
 0x3d0   : > { %v2630_v43 = vpack.c.bf16 %v2622_v63, %v2622_v63  ;;  %v2631_v23 = vpack.c.bf16 %v2623_v46, %v2623_v46  ;;  %v3093_v46 = vunpack.c.l.b16 %v527_v28 }
 0x3d2   : > { %v2646_v56 = vunpack.c.l.b16 %v2630_v43  ;;  %v2647_v36 = vunpack.c.l.b16 %v2631_v23  ;;  %v3056_v43 = vpack.c.b16 %v3051_v13, %v3051_v13 }
 0x3d3   : > { %v4531_v37 = vpop.permute.xlu2 %4530 }
 0x3d4   : > { %v4532_v20 = vunpack.i.l.bf16 %v4531_v37  ;;  %v4533_v60 = vunpack.i.h.bf16 %v4531_v37  ;;  %v2655_v29 = vrot.slane %v2647_v36, 6  ;;  %v4392_v37 = vld [vmem:[#allocation2 + $0x104] sm:$0xff] }
 0x3d5   : > { %3145 = vmatpush.bf16.msrb.mxu1 %v4392_v37  ;;  %v4564_v36 = vld [vmem:[%s5291_s6] sm:$0xff] }
 0x3d6   : > { %v2627_v6 = vmax.f32 %v5119_v55, %v4532_v20  ;;  %v2653_v55 = vrot.slane %v2646_v56, 7  ;;  %v3094_v20 = vpack.c.b16 %v3093_v46, %v3093_v46  ;;  %v3065_v56 = vsel %vm611_vm0, %v3056_v43, 0  ;;  %3357 = vmatpush.bf16.msrb.mxu2 %v4564_v36 }
 0x3d8   : > { %v2635_v38 = vpack.c.bf16 %v2627_v6, %v2627_v6  ;;  %v3102_v23 = vshll.u32 %v3094_v20, 16 }
 0x3e2   : > { %v4521_v18 = vpop.permute.xlu0 %4520 }
 0x3e3   : > { %v4523_v45 = vunpack.i.h.bf16 %v4521_v18  ;;  %v4522_v47 = vunpack.i.l.bf16 %v4521_v18 }
 0x3e5   : > { %v2624_v57 = vmax.f32 %v5103_v19, %v4523_v45  ;;  %v2621_v58 = vmax.f32 %v5101_v39, %v4522_v47  ;;  %v3198_v19 = vsel %vm611_vm0, %v3189_v41, 0  ;;  %v2628_v39 = vmax.f32 %v5121_v21, %v4533_v60 }
 0x3e6   : > { %3203 = vmatpush.bf16.msrb.mxu0 %v3198_v19  ;;  %v3095_v60 = vshrl.u32 %v4250_v44, 16 }
 0x3e7   : > { %v2629_v1 = vpack.c.bf16 %v2621_v58, %v2621_v58  ;;  %v2632_v31 = vpack.c.bf16 %v2624_v57, %v2624_v57  ;;  %v2636_v24 = vpack.c.bf16 %v2628_v39, %v2628_v39  ;;  %v4391_v57 = vld [vmem:[#allocation2 + $0xfc] sm:$0xff]  ;;  %v3164_v39 = vrot.slane %v4250_v44, 1 }
 0x3e8   : > { %v3100_v6 = vor.u32 %v3099_v0, %v3095_v60  ;;  %3146 = vmatpush.bf16.msrb.mxu1 %v4391_v57  ;;  %v5194_v0 = vld [vmem:[%s5292_s7] ss:$0 sm:$0xff] }
 0x3e9   : > { %v2645_v7 = vunpack.c.l.b16 %v2629_v1  ;;  %v2648_v61 = vunpack.c.l.b16 %v2632_v31  ;;  %v2652_v27 = vunpack.c.l.b16 %v2636_v24  ;;  %v3104_v31 = vrot.slane %v3102_v23, 1 }
 0x3ea   : > { %v4526_v8 = vpop.permute.xlu1 %4525  ;;  %3204 = vmatpush.bf16.msrb.mxu0 %v4398_v16 }
 0x3eb   : > { %v4528_v9 = vunpack.i.h.bf16 %v4526_v8  ;;  %v4527_v10 = vunpack.i.l.bf16 %v4526_v8  ;;  %v2654_v25 = vsel %vm1259_vm4, %v2653_v55, %v2645_v7  ;;  %v2657_v34 = vrot.slane %v2648_v61, 5  ;;  %v4390_v8 = vld [vmem:[#allocation2 + $0xf0] sm:$0xff] }
 0x3ec   : > { %v2656_v5 = vsel %vm1262_vm5, %v2655_v29, %v2654_v25  ;;  %v2665_v53 = vrot.slane %v2652_v27, 1  ;;  %v3105_v19 = vsel %vm567_vm1, %v3100_v6, %v3104_v31  ;;  %v3165_v7 = vrot.slane %v3094_v20, 1 }
 0x3ed   : > { %v2626_v21 = vmax.f32 %v5117_v12, %v4528_v9  ;;  %v2625_v17 = vmax.f32 %v5115_v54, %v4527_v10  ;;  %v4397_v12 = vld [vmem:[#allocation2 + $0x130] sm:$0xff]  ;;  %v2651_v54 = vunpack.c.l.b16 %v2635_v38  ;;  %v2658_v47 = vsel %vm1265_vm6, %v2657_v34, %v2656_v5  ;;  %4210 = vmatmul.msk.bf16.vlgmr.msrb.gmra.mxu1 %vm607_vm3, %v3105_v19  ;;  %v4389_v10 = vld [vmem:[#allocation2 + $0xe8] sm:$0xff] }
 0x3ee   : > { %3205 = vmatpush.bf16.msrb.mxu0 %v4397_v12  ;;  %v3166_v9 = vsel %vm685_vm2, %v3164_v39, %v3165_v7  ;;  %v1324_v7 = vmul.f32 %v5194_v0, %v4991_v50 }
 0x3ef   : > { %v2634_v49 = vpack.c.bf16 %v2626_v21, %v2626_v21  ;;  %v2633_v32 = vpack.c.bf16 %v2625_v17, %v2625_v17  ;;  %v2663_v45 = vrot.slane %v2651_v54, 2 }
 0x3f1   : > { %v2650_v35 = vunpack.c.l.b16 %v2634_v49  ;;  %v2649_v63 = vunpack.c.l.b16 %v2633_v32  ;;  %v2751_v55 = vpop.f32.mrf.mxu0 }
 0x3f2   : > { %3206 = vmatpush.bf16.msrb.mxu0 %v4396_v42 }
 0x3f3   : > { %v2661_v33 = vrot.slane %v2650_v35, 3  ;;  %v2659_v18 = vrot.slane %v2649_v63, 4  ;;  %v2795_v16 = vpop.f32.mrf.mxu2 }
 0x3f4   : > { %v2796_v26 = vadd.f32 %v2795_v16, %v2751_v55 }
 0x3f5   : > { %v2660_v52 = vsel %vm1268_vm7, %v2659_v18, %v2658_v47 }
 0x3f6   : > { %v2662_v41 = vsel %vm1271_vm8, %v2661_v33, %v2660_v52  ;;  %3207 = vmatpush.bf16.msrb.mxu0 %v4395_v59 }
 0x3f7   : > { %v2664_v58 = vsel %vm1274_vm9, %v2663_v45, %v2662_v41 }
 0x3f8   : > { %v2666_v1 = vsel %vm1277_vm10, %v2665_v53, %v2664_v58 }
 0x3f9   : > { %v2667_v4 = vpack.c.b16 %v2666_v1, %v2666_v1  ;;  %4227 = vmatmul.msk.bf16.vlgmr.msrb.gmra.mxu0 %vm607_vm3, %v3166_v9  ;;  %v2753_v61 = vpop.f32.mrf.mxu0 }
 0x3fb   : > { %4069 = vmatmul.msk.bf16.vlgmr.msrb.gmra.mxu3 %vm1304_vm11, %v2667_v4  ;;  %v2797_v48 = vpop.f32.mrf.mxu2 }
 0x3fc   : > { %3070 = vmatpush.bf16.msrb.mxu3 %v3065_v56 }
 0x3ff   : > { %v2903_v17 = vpop.f32.mrf.mxu1 }
 0x400   : > { %3071 = vmatpush.bf16.msrb.mxu3 %v4390_v8  ;;  %v5203_v8 = vld [vmem:[%s5293_s8] ss:$0 sm:$0xff] }
 0x401   : > { %v1328_v55 = vadd.f32 %v5203_v8, %v1324_v7 }
 0x404   : > { %3072 = vmatpush.bf16.msrb.mxu3 %v4389_v10 }
 0x405   : > { %v2958_v24 = vpop.f32.mrf.mxu0 }
 0x407   : > { %v2905_v49 = vpop.f32.mrf.mxu1 }
 0x408   : > { %3073 = vmatpush.bf16.msrb.mxu3 %v4388_v11 }
 0x40b   : > { %4121 = vmatmul.msk.bf16.vlgmr.msra.gmra.mxu3 %vm607_vm3, %v4970_v62  ;;  %v2798_v62 = vadd.f32 %v2797_v48, %v2753_v61  ;;  %v2005_v48 = vmul.f32 %v5194_v0, %v5085_v40 }
 0x40c   : > { %3074 = vmatpush.bf16.msrb.mxu3 %v4387_v14  ;;  %v3013_v34 = vpop.f32.mrf.mxu2 }
 0x40d   : > { %v2960_v12 = vpop.f32.mrf.mxu0 }
 0x414   : > { %v3015_v18 = vpop.f32.mrf.mxu2 }
 0x41b   : > { %4193 = vmatmul.msk.bf16.vlgmr.msrb.gmra.mxu3 %vm607_vm3, %v4250_v44 }
 0x46a   : > { %v3148_v13 = vpop.f32.mrf.mxu1 }
 0x472   : > { %v3150_v43 = vpop.f32.mrf.mxu1 }
 0x476   : > { %v3209_v37 = vpop.f32.mrf.mxu0 }
 0x47e   : > { %v5187_v38 = vpop.f32.mrf.mxu3  ;;  %v3211_v53 = vpop.f32.mrf.mxu0 }
 0x486   : > { %v2682_v21 = vpop.f32.mrf.mxu3 }
 0x48e   : > { %v2848_v25 = vpop.f32.mrf.mxu3 }
 0x48f   : > { %v2853_v29 = vadd.f32 %v2848_v25, %v2796_v26  ;;  %v1329_v26 = vmax.f32 %v1328_v55, 0.0 }
 0x491   : > { %v2908_v32 = vadd.f32 %v2903_v17, %v2853_v29 }
 0x493   : > { %v2963_v15 = vadd.f32 %v2958_v24, %v2908_v32  ;;  %v2684_v32 = vmul.f32 %v5194_v0, %v5187_v38 }
 0x495   : > { %v3018_v35 = vadd.f32 %v3013_v34, %v2963_v15 }
 0x496   : > { %v2850_v54 = vpop.f32.mrf.mxu3 }
 0x497   : > { %v2854_v5 = vadd.f32 %v2850_v54, %v2798_v62  ;;  %v5217_v54 = vadd.f32 %v5203_v8, %v2684_v32 }
 0x499   : > { %v2909_v63 = vadd.f32 %v2905_v49, %v2854_v5  ;;  %v2686_v34 = vmax.f32 %v5217_v54, 0.0 }
 0x49b   : > { %v2964_v28 = vadd.f32 %v2960_v12, %v2909_v63  ;;  %v2006_v12 = vadd.f32 %v5203_v8, %v2005_v48 }
 0x49d   : > { %v3019_v46 = vadd.f32 %v3015_v18, %v2964_v28  ;;  %v2007_v62 = vmax.f32 %v2006_v12, 0.0 }
 0x49e   : > { %v3076_v44 = vpop.f32.mrf.mxu3 }
 0x49f   : > { %v3081_v27 = vadd.f32 %v3076_v44, %v3018_v35 }
 0x4a1   : > { %v3153_v33 = vadd.f32 %v3148_v13, %v3081_v27 }
 0x4a3   : > { %v3214_v42 = vadd.f32 %v3209_v37, %v3153_v33 }
 0x4a5   : > { %v3216_v45 = vmul.f32 %v5090_v30, %v3214_v42 }
 0x4a6   : > { %v3078_v47 = vpop.f32.mrf.mxu3 }
 0x4a7   : > { %v3218_v51 = vadd.f32 %v5096_v2, %v3216_v45  ;;  %v3082_v52 = vadd.f32 %v3078_v47, %v3019_v46 }
 0x4a9   : > { %v3220_v20 = vmax.f32 %v3218_v51, 0.0  ;;  %v3154_v22 = vadd.f32 %v3150_v43, %v3082_v52 }
 0x4ab   : > { %v3215_v41 = vadd.f32 %v3211_v53, %v3154_v22  ;;  %v3226_v57 = vrot.slane %v3220_v20, 6  ;;  %v4228_v58 = vrot.slane %v3220_v20, 9  ;;  %v3224_v59 = vrot.slane %v3220_v20, 2 }
 0x4ac   : > { %v3225_v60 = vrot.slane %v3220_v20, 4 }
 0x4ad   : > { %v3217_v23 = vmul.f32 %v5090_v30, %v3215_v41  ;;  %v4231_v1 = vrot.slane %v3226_v57, 9  ;;  %v4229_v3 = vrot.slane %v3224_v59, 9  ;;  %v3260_v6 = vmax.f32 %v3220_v20, %v4228_v58 }
 0x4ae   : > { %v4230_v4 = vrot.slane %v3225_v60, 9 }
 0x4af   : > { %v3219_v56 = vadd.f32 %v5096_v2, %v3217_v23  ;;  %v3263_v31 = vmax.f32 %v3226_v57, %v4231_v1  ;;  %v3261_v19 = vmax.f32 %v3224_v59, %v4229_v3 }
 0x4b0   : > { %v3262_v39 = vmax.f32 %v3225_v60, %v4230_v4 }
 0x4b1   : > { %v3221_v36 = vmax.f32 %v3219_v56, 0.0  ;;  %v4539_v9 = vpack.i.bf16 %v3263_v31, %v3260_v6 }
 0x4b2   : > { %v4534_v30 = vpack.i.bf16 %v3262_v39, %v3261_v19 }
 0x4b3   : > { %4540 = vrot.lane.b32.xlu1 %v4539_v9, %s4682_s18  ;;  %v3228_v10 = vrot.slane %v3221_v36, 4  ;;  %v3229_v11 = vrot.slane %v3221_v36, 6  ;;  %v3227_v2 = vrot.slane %v3221_v36, 2  ;;  %v4232_v14 = vrot.slane %v3221_v36, 9 }
 0x4b4   : > { %4535 = vrot.lane.b32.xlu0 %v4534_v30, %s4682_s18 }
 0x4b5   : > { %v4234_v61 = vrot.slane %v3228_v10, 9  ;;  %v4235_v50 = vrot.slane %v3229_v11, 9  ;;  %v4233_v16 = vrot.slane %v3227_v2, 9  ;;  %v3264_v24 = vmax.f32 %v3221_v36, %v4232_v14 }
 0x4b7   : > { %v3266_v21 = vmax.f32 %v3228_v10, %v4234_v61  ;;  %v3267_v17 = vmax.f32 %v3229_v11, %v4235_v50  ;;  %v3265_v25 = vmax.f32 %v3227_v2, %v4233_v16 }
 0x4b9   : > { %v4549_v29 = vpack.i.bf16 %v3267_v17, %v3266_v21  ;;  %v4544_v49 = vpack.i.bf16 %v3265_v25, %v3264_v24 }
 0x4bb   : > { %1331 = vrot.lane.b32.xlu1 %v1329_v26, %s4682_s18  ;;  %4545 = vrot.lane.b32.xlu2 %v4544_v49, %s4682_s18 }
 0x4bc   : > { %4550 = vrot.lane.b32.xlu0 %v4549_v29, %s4682_s18 }
 0x4c3   : > { %2009 = vrot.lane.b32.xlu2 %v2007_v62, %s4682_s18 }
 0x4c4   : > { %2688 = vrot.lane.b32.xlu0 %v2686_v34, %s4682_s18 }
 0x515   : > { %v4546_v40 = vpop.permute.xlu2 %4545 }
 0x516   : > { %v4547_v5 = vunpack.i.l.bf16 %v4546_v40  ;;  %v4548_v63 = vunpack.i.h.bf16 %v4546_v40 }
 0x518   : > { %v3304_v13 = vmax.f32 %v3264_v24, %v4547_v5  ;;  %v3305_v47 = vmax.f32 %v3265_v25, %v4548_v63 }
 0x51a   : > { %v3312_v51 = vpack.c.bf16 %v3304_v13, %v3304_v13  ;;  %v3313_v59 = vpack.c.bf16 %v3305_v47, %v3305_v47 }
 0x51c   : > { %v3328_v60 = vunpack.c.l.b16 %v3312_v51  ;;  %v3329_v9 = vunpack.c.l.b16 %v3313_v59 }
 0x51d   : > { %v2010_v38 = vpop.permute.xlu2 %2009 }
 0x51e   : > { %v2012_v15 = vadd.f32 %v2010_v38, %v2007_v62  ;;  %v3338_v10 = vrot.slane %v3328_v60, 4  ;;  %v3340_v16 = vrot.slane %v3329_v9, 3 }
 0x520   : > { %3903 = vst.msk [vmem:[%s5225_s23 + $0x8] sm:$0xff] %vm1304_vm11, %v2012_v15 }
 0x525   : > { %v4541_v35 = vpop.permute.xlu1 %4540 }
 0x526   : > { %v4543_v44 = vunpack.i.h.bf16 %v4541_v35  ;;  %v4542_v27 = vunpack.i.l.bf16 %v4541_v35  ;;  %v4536_v37 = vpop.permute.xlu0 %4535 }
 0x527   : > { %v4538_v28 = vunpack.i.h.bf16 %v4536_v37  ;;  %v4537_v33 = vunpack.i.l.bf16 %v4536_v37 }
 0x528   : > { %v3303_v18 = vmax.f32 %v3263_v31, %v4543_v44  ;;  %v3300_v42 = vmax.f32 %v3260_v6, %v4542_v27 }
 0x529   : > { %v3302_v46 = vmax.f32 %v3262_v39, %v4538_v28  ;;  %v3301_v45 = vmax.f32 %v3261_v19, %v4537_v33 }
 0x52a   : > { %v3311_v52 = vpack.c.bf16 %v3303_v18, %v3303_v18  ;;  %v3308_v43 = vpack.c.bf16 %v3300_v42, %v3300_v42 }
 0x52b   : > { %v3310_v20 = vpack.c.bf16 %v3302_v46, %v3302_v46  ;;  %v3309_v22 = vpack.c.bf16 %v3301_v45, %v3301_v45 }
 0x52c   : > { %v3327_v53 = vunpack.c.l.b16 %v3311_v52  ;;  %v3324_v23 = vunpack.c.l.b16 %v3308_v43 }
 0x52d   : > { %v3326_v41 = vunpack.c.l.b16 %v3310_v20  ;;  %v3325_v57 = vunpack.c.l.b16 %v3309_v22  ;;  %v1332_v58 = vpop.permute.xlu1 %1331 }
 0x52e   : > { %v1334_v1 = vadd.f32 %v1332_v58, %v1329_v26  ;;  %v4551_v3 = vpop.permute.xlu0 %4550  ;;  %v3336_v19 = vrot.slane %v3327_v53, 5 }
 0x52f   : > { %v3334_v4 = vrot.slane %v3326_v41, 6  ;;  %v3332_v56 = vrot.slane %v3325_v57, 7  ;;  %v4553_v6 = vunpack.i.h.bf16 %v4551_v3  ;;  %v4552_v31 = vunpack.i.l.bf16 %v4551_v3 }
 0x530   : > { %1335 = vst.msk [vmem:[%s5225_s23] sm:$0xff] %vm1304_vm11, %v1334_v1 }
 0x531   : > { %v3333_v39 = vsel %vm1259_vm4, %v3332_v56, %v3324_v23  ;;  %v3307_v7 = vmax.f32 %v3267_v17, %v4553_v6  ;;  %v3306_v36 = vmax.f32 %v3266_v21, %v4552_v31 }
 0x532   : > { %v3335_v30 = vsel %vm1262_vm5, %v3334_v4, %v3333_v39 }
 0x533   : > { %v3337_v11 = vsel %vm1265_vm6, %v3336_v19, %v3335_v30  ;;  %v3315_v2 = vpack.c.bf16 %v3307_v7, %v3307_v7  ;;  %v3314_v14 = vpack.c.bf16 %v3306_v36, %v3306_v36 }
 0x534   : > { %v3339_v50 = vsel %vm1268_vm7, %v3338_v10, %v3337_v11 }
 0x535   : > { %v3331_v55 = vunpack.c.l.b16 %v3315_v2  ;;  %v3330_v61 = vunpack.c.l.b16 %v3314_v14  ;;  %v3341_v17 = vsel %vm1271_vm8, %v3340_v16, %v3339_v50 }
 0x536   : > { %v2689_v24 = vpop.permute.xlu0 %2688 }
 0x537   : > { %v3344_v25 = vrot.slane %v3331_v55, 1  ;;  %v3342_v26 = vrot.slane %v3330_v61, 2  ;;  %v2691_v21 = vadd.f32 %v2689_v24, %v2686_v34 }
 0x539   : > { %v3343_v48 = vsel %vm1274_vm9, %v3342_v26, %v3341_v17  ;;  %4070 = vst.msk [vmem:[%s5225_s23 + $0x10] sm:$0xff] %vm1304_vm11, %v2691_v21 }
 0x53a   : > { %v3345_v29 = vsel %vm1277_vm10, %v3344_v25, %v3343_v48 }
 0x53b   : > { %v3346_v49 = vpack.c.b16 %v3345_v29, %v3345_v29 }
 0x53d   : > { %4236 = vmatmul.msk.bf16.vlgmr.msrb.gmra.mxu2 %vm1304_vm11, %v3346_v49 }
 0x5c0   : > { %v3359_v32 = vpop.f32.mrf.mxu2 }
 0x5c1   : > { %v3363_v12 = vmul.f32 %v5194_v0, %v3359_v32 }
 0x5c3   : > { %v3364_v54 = vadd.f32 %v5203_v8, %v3363_v12 }
 0x5c5   : > { %v3365_v62 = vmax.f32 %v3364_v54, 0.0 }
 0x5c7   : > { %3367 = vrot.lane.b32.xlu1 %v3365_v62, %s4682_s18  ;;  %s4611_s18 = scalar_lea.hbm %s4610_s20, 32 }
 0x5c8   : > { %v3361_v34 = vpop.f32.mrf.mxu2  ;;  %p4612_p1 = scmp.ne.s32.totalorder %s4610_s20, %s4611_s18  ;;  %p4617_p6 = scmp.lt.s32.totalorder %s4615_s24, %s4611_s18 }
 0x5ca   : > { %p4613_p2 = pnand %p4612_p1, %p4775_p4  ;;  %p4618_p7 = por %p4617_p6, %p4616_p5 }
 0x5cc   : > { %p4614_p3 = pneg %p4613_p2 }
 0x5ce   : > { %p4619_p9 = pnand %p4618_p7, %p4614_p3 }
 0x639   : > { %v3368_v40 = vpop.permute.xlu1 %3367 }
 0x63a   : > { %v3370_v38 = vadd.f32 %v3368_v40, %v3365_v62 }
 0x63c   : > { %4237 = vst.msk [vmem:[%s5225_s23 + $0x18] sm:$0xff] %vm1304_vm11, %v3370_v38 }
 0x63d   : > { %4622 = shalt.err (!%p4619_p9)
}
 0x63e   : > { %s4683_s26 = smov 128   ;;  %s4684_s23 = smov 8  }
 0x63f   : > { %4406 = dma.vmem_to_hbm [thread:$0]  (%p4775_p4), %s3389_s28, 512, %s3391_s29, %s3374_s15, %s4683_s26, %s4683_s26, %s4684_s23  }
 0x640 PF: > { %p4419_p10 = scmp.ge.s32.totalorder %s4677_s14, 2  ;;  %s3405_s12 = sand.u32 1, %s4657_s30  }
 0x641   : > { %s3406_s25 = scalar_lea.sflag [#allocation4], %s3405_s12 }
 0x642   : > { %p4413_p11 = pnand %p4419_p10, %p4782_p8 }
 0x644   : > { %p4414_p12 = pneg %p4413_p11 }
 0x646   : > { %4652 = dma.done.wait (%p4414_p12), %s3406_s25, 512  }
 0x647   : > { %4654 = vsyncadd (%p4414_p12), %s3406_s25, 4294966784  ;;  %s23_s14 = sadd.s32 1, %s4677_s14   ;;  %s5297_s30 = smov %s4661_s10 }
 0x648   : > { %p20_p13 = scmp.ge.s32.totalorder %s23_s14, 4   ;;  %s5298_s10 = smov %s4665_s11 }
 0x649   : > { %s5299_s11 = smov %s4788_s22  ;;  %s5300_s12 = smov %s4673_s13 }
 0x64a   : > { %s5301_s13 = smov %s5303_s17  ;;  %22 = sbr.rel (!%p20_p13) target bundleno = 5 (0x5), region = 116 }
 0x64f   :  { %3412 = vsyncpa [#allocation3], 1 }
 0x650   :  { %3414 = vsyncpa [#allocation3 + $0x1], 1 }
 0x651   :  { %3415 = vsyncpa [#allocation4], 1 }
 0x652   :  { %3417 = vsyncpa [#allocation4 + $0x1], 1 }

</bundles_post_ra>
